<compile_context>
chip_gen: v6e
topology: v6e:2x2x1
jax: 0.10.0
libtpu: 0.0.40
codegen_flags: <defaults>
</compile_context>

<pallas_src>
import math
import functools

import jax
import jax.numpy as jnp
from jax.experimental import pallas as pl
from jax.experimental.pallas import tpu as pltpu  # noqa: F401  (TPU backend assumed)

# ----------------------------- configuration --------------------------------
MORPHO_DIM   = 8                         # args.morpho_dim_hidden
STEM_DIM     = 32                        # args.stem_dim_hidden
HIDDEN       = MORPHO_DIM * 4 + STEM_DIM # 64 = morpho_dim_hidden*4 + stem_dim_hidden
NUM_HEADS    = 4                         # args.main_sequence_encoder_num_heads
HEAD_DIM     = HIDDEN // NUM_HEADS       # 16
DIM_FFN      = 128                       # args.main_sequence_encoder_dim_ffn
NUM_LAYERS   = 2                         # args.main_sequence_encoder_num_layers
REL_POS_BINS = 32                        # args.main_sequence_encoder_rel_pos_bins
MAX_REL_POS  = 128                       # args.main_sequence_encoder_max_rel_pos

TOT_STEMS     = 50                       # cfg.tot_num_stems
TOT_AFFIXES   = 40
TOT_LM_MORPHS = 30
TOT_POS_TAGS  = 20
MAX_AFX       = 4                        # affix slots per token (padded)


# ----------------------------- Pallas kernel --------------------------------
def fused_encoder_kernel(x_ref, cbias_ref,
                         wqkv_ref, bqkv_ref, wo_ref, bo_ref,
                         ln1g_ref, ln1b_ref,
                         w1_ref, b1_ref, w2_ref, b2_ref,
                         ln2g_ref, ln2b_ref,
                         o_ref, *, num_layers, num_heads):
    """Both post-norm encoder layers, whole batch, one kernel invocation.

    x_ref:     (B*L, H) f32   flattened padded activations
    cbias_ref: (nh, B*L, B*L) f32  combined rel-pos bias + block-diagonal batch
               mask + key-padding mask, so attention runs over the whole B*L
               slab with one 2-D matmul per head (no per-batch grid steps).
    weights:   stacked over layers (leading dim = num_layers); matmul weights
               are bf16 (MXU operands), biases / LayerNorm params are f32.
    """
    BL, H = x_ref.shape
    hd = H // num_heads
    x = x_ref[...]                                         # (BL, H) f32

    def layer_norm(v, g, b):
        mu = jnp.mean(v, axis=-1, keepdims=True)
        var = jnp.mean((v - mu) ** 2, axis=-1, keepdims=True)
        return (v - mu) * jax.lax.rsqrt(var + 1e-5) * g + b

    for layer in range(num_layers):                        # static unroll (2 layers)
        # fused QKV projection over the whole (B*L, H) slab (bf16 MXU operands).
        # The 1/sqrt(hd) scale is pre-folded into the Q columns by the wrapper.
        qkv = jnp.dot(x.astype(jnp.bfloat16), wqkv_ref[layer],
                      preferred_element_type=jnp.float32) + bqkv_ref[layer]
        wo = wo_ref[layer]                                 # (H, H) bf16

        attn = jnp.zeros((BL, H), jnp.float32)
        for h in range(num_heads):                         # static unroll (4 heads)
            q = qkv[:, h * hd:(h + 1) * hd]                        # (BL, hd)
            k = qkv[:, H + h * hd:H + (h + 1) * hd]                # (BL, hd)
            v = qkv[:, 2 * H + h * hd:2 * H + (h + 1) * hd]        # (BL, hd)
            s = jax.lax.dot_general(q.astype(jnp.bfloat16), k.astype(jnp.bfloat16),
                                    (((1,), (1,)), ((), ())),
                                    preferred_element_type=jnp.float32)  # (BL, BL)
            s = s + cbias_ref[h]             # rel-pos bias + batch block mask + key pad
            s = s - jnp.max(s, axis=-1, keepdims=True)
            p = jnp.exp(s)
            p = p * pl.reciprocal(jnp.sum(p, axis=-1, keepdims=True), approx=True)
            o_h = jnp.dot(p.astype(jnp.bfloat16), v.astype(jnp.bfloat16),
                          preferred_element_type=jnp.float32)            # (BL, hd)
            # accumulate output projection head-slice by head-slice (no lane concat)
            attn = attn + jnp.dot(o_h.astype(jnp.bfloat16),
                                  wo[h * hd:(h + 1) * hd, :],
                                  preferred_element_type=jnp.float32)
        attn = attn + bo_ref[layer]

        # residual + LayerNorm (post-norm, PyTorch TransformerEncoderLayer default)
        y = layer_norm(x + attn, ln1g_ref[layer], ln1b_ref[layer])

        # feed-forward with GELU
        h1 = jnp.dot(y.astype(jnp.bfloat16), w1_ref[layer],
                     preferred_element_type=jnp.float32) + b1_ref[layer]
        # TODO(synk): PyTorch activation='gelu' is exact-erf GELU; tanh
        # approximation used here (EUP tanh), max abs diff ~1e-3.
        h1 = 0.5 * h1 * (1.0 + jnp.tanh(0.7978845608028654 *
                                        (h1 + 0.044715 * h1 * h1 * h1)))
        z = jnp.dot(h1.astype(jnp.bfloat16), w2_ref[layer],
                    preferred_element_type=jnp.float32) + b2_ref[layer]

        x = layer_norm(y + z, ln2g_ref[layer], ln2b_ref[layer])

    o_ref[...] = x.astype(o_ref.dtype)


def run_encoder(x2d, cbias, stacked_weights):
    """x2d: (B*L, H) f32; cbias: (nh, B*L, B*L) f32."""
    BL, H = x2d.shape
    return pl.pallas_call(
        functools.partial(fused_encoder_kernel,
                          num_layers=NUM_LAYERS, num_heads=NUM_HEADS),
        out_shape=jax.ShapeDtypeStruct((BL, H), jnp.float32),
        # No grid: whole (tiny) problem is one kernel invocation with full-array
        # VMEM blocks -> no per-grid-step prologue/epilogue overhead.
    )(x2d, cbias, *stacked_weights)


# ----------------------------- parameters ------------------------------------
def init_params(key):
    ks = iter(jax.random.split(key, 64))

    def nrm(shape, std=0.02):
        return std * jax.random.normal(next(ks), shape, dtype=jnp.float32)

    p = {}
    # embeddings (init_bert_params: N(0, 0.02); padding_idx rows zeroed)
    p["stem_emb"]   = nrm((TOT_STEMS, STEM_DIM)).at[0].set(0.0)
    p["stem_m_emb"] = nrm((TOT_STEMS, MORPHO_DIM)).at[0].set(0.0)
    p["morph_emb"]  = nrm((TOT_LM_MORPHS, MORPHO_DIM))
    p["pos_emb"]    = nrm((TOT_POS_TAGS, MORPHO_DIM))
    p["afx_emb"]    = nrm((TOT_AFFIXES, MORPHO_DIM)).at[0].set(0.0)
    p["rel_emb"]    = nrm((REL_POS_BINS, NUM_HEADS))      # PositionEncoding bias table

    layers = []
    for _ in range(NUM_LAYERS):
        layers.append((
            nrm((HIDDEN, 3 * HIDDEN)),                 # in_proj weight (QKV)
            jnp.zeros((1, 3 * HIDDEN), jnp.float32),   # in_proj bias
            nrm((HIDDEN, HIDDEN)),                     # out_proj weight
            jnp.zeros((1, HIDDEN), jnp.float32),       # out_proj bias
            jnp.ones((1, HIDDEN), jnp.float32),        # LN1 gamma
            jnp.zeros((1, HIDDEN), jnp.float32),       # LN1 beta
            nrm((HIDDEN, DIM_FFN)),                    # FFN linear1
            jnp.zeros((1, DIM_FFN), jnp.float32),
            nrm((DIM_FFN, HIDDEN)),                    # FFN linear2
            jnp.zeros((1, HIDDEN), jnp.float32),
            jnp.ones((1, HIDDEN), jnp.float32),        # LN2 gamma
            jnp.zeros((1, HIDDEN), jnp.float32),       # LN2 beta
        ))
    p["layers"] = layers
    return p


# ----------------------------- JAX glue ---------------------------------------
def morpho_encoder(params, stems, lm_morphs, pos_tags, afx_padded, m_masks_padded):
    """Simplified MorphoEncoder: 4 morpho feature vectors per token -> (4, N, Dm)."""
    stem_m = params["stem_m_emb"][stems]
    morph  = params["morph_emb"][lm_morphs]
    pos    = params["pos_emb"][pos_tags]
    afx    = params["afx_emb"][afx_padded]                 # (N, MAX_AFX, Dm)
    valid  = (~m_masks_padded).astype(jnp.float32)[..., None]
    afx_avg = jnp.sum(afx * valid, axis=1) / jnp.maximum(jnp.sum(valid, axis=1), 1.0)
    return jnp.stack([stem_m, morph, pos, afx_avg], axis=0)


def _rel_pos_bucket(rel, num_buckets, max_distance):
    num_buckets = num_buckets // 2
    ret = (rel > 0).astype(jnp.int32) * num_buckets
    n = jnp.abs(rel)
    max_exact = num_buckets // 2
    is_small = n < max_exact
    n_safe = jnp.maximum(n, 1)                             # clamp before log (n=0 safe)
    val_large = max_exact + (
        jnp.log(n_safe.astype(jnp.float32) / max_exact)
        / math.log(max_distance / max_exact) * (num_buckets - max_exact)
    ).astype(jnp.int32)
    val_large = jnp.minimum(val_large, num_buckets - 1)
    return ret + jnp.where(is_small, n, val_large)


def rel_pos_bias(rel_emb, L):
    pos = jnp.arange(L)
    rel = pos[None, :] - pos[:, None]                      # (L, L)
    buckets = _rel_pos_bucket(rel, REL_POS_BINS, MAX_REL_POS)
    bias = rel_emb[buckets]                                # (L, L, nh)
    return jnp.transpose(bias, (2, 0, 1)).astype(jnp.float32)  # (nh, L, L)


def build_combined_bias(rel_emb, masks_padded, B, L):
    """(nh, B*L, B*L): rel-pos bias on in-sequence pairs, -1e9 across sequences
    and on padded key positions (PyTorch src_key_padding_mask semantics)."""
    bias = rel_pos_bias(rel_emb, L)                        # (nh, L, L)
    BL = B * L
    batch_idx = jnp.repeat(jnp.arange(B), L)               # (BL,)
    local_idx = jnp.tile(jnp.arange(L), B)                 # (BL,)
    same_seq = batch_idx[:, None] == batch_idx[None, :]    # (BL, BL)
    full_bias = bias[:, local_idx[:, None], local_idx[None, :]]   # (nh, BL, BL)
    key_pad = masks_padded.reshape(BL)                     # (BL,) True = padded key
    keep = same_seq & (~key_pad)[None, :]
    add_mask = jnp.where(keep, 0.0, -1e9).astype(jnp.float32)     # (BL, BL)
    return full_bias * same_seq[None].astype(jnp.float32) + add_mask[None]


def stack_and_prepare_layer_weights(layers):
    """Stack per-layer params over a leading layer axis, fold the 1/sqrt(hd)
    attention scale into the Q columns, and cast matmul weights to bf16."""
    stacks = [jnp.stack(ws, axis=0) for ws in zip(*layers)]
    wqkv, bqkv, wo, bo, ln1g, ln1b, w1, b1, w2, b2, ln2g, ln2b = stacks
    scale = 1.0 / math.sqrt(HEAD_DIM)
    wqkv = wqkv.at[:, :, :HIDDEN].multiply(scale)          # scale Q weight columns
    bqkv = bqkv.at[:, :, :HIDDEN].multiply(scale)          # scale Q bias entries
    bf = lambda w: w.astype(jnp.bfloat16)
    return (bf(wqkv), bqkv, bf(wo), bo, ln1g, ln1b,
            bf(w1), b1, bf(w2), b2, ln2g, ln2b)


def mybert_forward(params, lm_morphs, pos_tags, stems, input_sequence_lengths,
                   afx_padded, m_masks_padded, masks_padded):
    N = stems.shape[0]
    # morpho features -> permute(1,0,2) -> view(N, -1)
    morpho = morpho_encoder(params, stems, lm_morphs, pos_tags,
                            afx_padded, m_masks_padded)                 # (4, N, Dm)
    morpho = jnp.transpose(morpho, (1, 0, 2)).reshape(N, 4 * MORPHO_DIM)
    stem_in = params["stem_emb"][stems]                                  # (N, STEM_DIM)
    seqs = jnp.concatenate([morpho, stem_in], axis=1)                    # (N, HIDDEN)

    # torch.split + pad_sequence equivalent; kernel layout is a flat (B*L, H) slab
    B = len(input_sequence_lengths)
    L = max(input_sequence_lengths)
    padded, off = [], 0
    for slen in input_sequence_lengths:
        seg = seqs[off:off + slen]
        padded.append(jnp.pad(seg, ((0, L - slen), (0, 0))))
        off += slen
    x = jnp.stack(padded, axis=0).astype(jnp.float32)                    # (B, L, H)
    x2d = x.reshape(B * L, HIDDEN)                                       # (B*L, H)

    # combined rel-pos bias + block-diagonal batch mask + key-padding mask
    # TODO(synk): O(nh*(B*L)^2) resident bias is fine at this scale; tile over
    # the key dimension if the model is ever scaled to long sequences.
    cbias = build_combined_bias(params["rel_emb"], masks_padded, B, L)

    weights = stack_and_prepare_layer_weights(params["layers"])

    out2d = run_encoder(x2d, cbias, weights)                             # (B*L, H)
    out = out2d.reshape(B, L, HIDDEN)
    return jnp.transpose(out, (1, 0, 2))                                 # (L, B, H)


# ----------------------------- main --------------------------------------------
if __name__ == "__main__":
    root = jax.random.PRNGKey(0)
    k_params, k0, k1, k2, k3 = jax.random.split(root, 5)
    params = init_params(k_params)

    input_sequence_lengths = [5, 3]                     # B = 2 sequences, N = 8 tokens
    N = sum(input_sequence_lengths)
    B = len(input_sequence_lengths)
    L = max(input_sequence_lengths)

    stems      = jax.random.randint(k0, (N,), 1, TOT_STEMS)
    lm_morphs  = jax.random.randint(k1, (N,), 1, TOT_LM_MORPHS)
    pos_tags   = jax.random.randint(k2, (N,), 1, TOT_POS_TAGS)
    afx_padded = jax.random.randint(k3, (N, MAX_AFX), 0, TOT_AFFIXES)
    m_masks_padded = (afx_padded == 0)                  # True = padded affix slot
    masks_padded = jnp.stack([
        jnp.arange(L) >= slen for slen in input_sequence_lengths
    ])                                                  # (B, L); True = padded position

    out = mybert_forward(params, lm_morphs, pos_tags, stems, input_sequence_lengths,
                         afx_padded, m_masks_padded, masks_padded)
    jax.block_until_ready(out)
    assert out.shape == (L, B, HIDDEN)
    print("KERNEL_OK")
</pallas_src>

<mosaic_0001>
module attributes {stable_mosaic.version = 11 : i64} {
  func.func @fused_encoder_kernel(%arg0: memref<10x64xf32, #tpu.memory_space<vmem>>, %arg1: memref<4x10x10xf32, #tpu.memory_space<vmem>>, %arg2: memref<2x64x192xbf16, #tpu.memory_space<vmem>>, %arg3: memref<2x1x192xf32, #tpu.memory_space<vmem>>, %arg4: memref<2x64x64xbf16, #tpu.memory_space<vmem>>, %arg5: memref<2x1x64xf32, #tpu.memory_space<vmem>>, %arg6: memref<2x1x64xf32, #tpu.memory_space<vmem>>, %arg7: memref<2x1x64xf32, #tpu.memory_space<vmem>>, %arg8: memref<2x64x128xbf16, #tpu.memory_space<vmem>>, %arg9: memref<2x1x128xf32, #tpu.memory_space<vmem>>, %arg10: memref<2x128x64xbf16, #tpu.memory_space<vmem>>, %arg11: memref<2x1x64xf32, #tpu.memory_space<vmem>>, %arg12: memref<2x1x64xf32, #tpu.memory_space<vmem>>, %arg13: memref<2x1x64xf32, #tpu.memory_space<vmem>>, %arg14: memref<10x64xf32, #tpu.memory_space<vmem>>) attributes {dimension_semantics = [], scalar_prefetch = 0 : i64, scratch_operands = 0 : i64, tpu.core_type = #tpu.core_type<tc>} {
    %c0 = arith.constant 0 : index
    %c0_0 = arith.constant 0 : index
    %0 = vector.load %arg0[%c0, %c0_0] : memref<10x64xf32, #tpu.memory_space<vmem>>, vector<10x64xf32>
    %1 = arith.truncf %0 : vector<10x64xf32> to vector<10x64xbf16>
    %c0_1 = arith.constant 0 : index
    %c0_2 = arith.constant 0 : index
    %c0_3 = arith.constant 0 : index
    %2 = vector.load %arg2[%c0_1, %c0_2, %c0_3] : memref<2x64x192xbf16, #tpu.memory_space<vmem>>, vector<1x64x192xbf16>
    %3 = vector.shape_cast %2 : vector<1x64x192xbf16> to vector<64x192xbf16>
    %cst = arith.constant dense<0.000000e+00> : vector<10x192xf32>
    %4 = tpu.matmul %1, %3, %cst {dimension_numbers = #tpu.dot_dimension_numbers<[1], [0], [0], [1], [0, 0, 1, 1], [], []>} : vector<10x64xbf16>, vector<64x192xbf16>, vector<10x192xf32> -> vector<10x192xf32>
    %c0_4 = arith.constant 0 : index
    %c0_5 = arith.constant 0 : index
    %c0_6 = arith.constant 0 : index
    %5 = vector.load %arg3[%c0_4, %c0_5, %c0_6] : memref<2x1x192xf32, #tpu.memory_space<vmem>>, vector<1x1x192xf32>
    %6 = vector.shape_cast %5 : vector<1x1x192xf32> to vector<1x192xf32>
    %7 = vector.broadcast %6 : vector<1x192xf32> to vector<10x192xf32>
    %8 = arith.addf %4, %7 : vector<10x192xf32>
    %c0_7 = arith.constant 0 : index
    %c0_8 = arith.constant 0 : index
    %c0_9 = arith.constant 0 : index
    %9 = vector.load %arg4[%c0_7, %c0_8, %c0_9] : memref<2x64x64xbf16, #tpu.memory_space<vmem>>, vector<1x64x64xbf16>
    %10 = vector.shape_cast %9 : vector<1x64x64xbf16> to vector<64x64xbf16>
    %cst_10 = arith.constant 0.000000e+00 : f32
    %11 = vector.broadcast %cst_10 : f32 to vector<10x64xf32>
    %12 = vector.extract_strided_slice %8 {offsets = [0, 0], sizes = [10, 16], strides = [1, 1]} : vector<10x192xf32> to vector<10x16xf32>
    %13 = vector.extract_strided_slice %8 {offsets = [0, 64], sizes = [10, 16], strides = [1, 1]} : vector<10x192xf32> to vector<10x16xf32>
    %14 = vector.extract_strided_slice %8 {offsets = [0, 128], sizes = [10, 16], strides = [1, 1]} : vector<10x192xf32> to vector<10x16xf32>
    %15 = arith.truncf %12 : vector<10x16xf32> to vector<10x16xbf16>
    %16 = arith.truncf %13 : vector<10x16xf32> to vector<10x16xbf16>
    %cst_11 = arith.constant dense<0.000000e+00> : vector<10x10xf32>
    %17 = tpu.matmul %15, %16, %cst_11 {dimension_numbers = #tpu.dot_dimension_numbers<[1], [1], [0], [0], [0, 0, 1, 0], [], []>} : vector<10x16xbf16>, vector<10x16xbf16>, vector<10x10xf32> -> vector<10x10xf32>
    %c0_12 = arith.constant 0 : index
    %c0_13 = arith.constant 0 : index
    %c0_14 = arith.constant 0 : index
    %18 = vector.load %arg1[%c0_12, %c0_13, %c0_14] : memref<4x10x10xf32, #tpu.memory_space<vmem>>, vector<1x10x10xf32>
    %19 = vector.shape_cast %18 : vector<1x10x10xf32> to vector<10x10xf32>
    %20 = arith.addf %17, %19 : vector<10x10xf32>
    %cst_15 = arith.constant dense<0xFF800000> : vector<10xf32>
    %21 = vector.multi_reduction <maximumf>, %20, %cst_15 [1] : vector<10x10xf32> to vector<10xf32>
    %22 = vector.shape_cast %21 : vector<10xf32> to vector<10x1xf32>
    %23 = vector.broadcast %22 : vector<10x1xf32> to vector<10x10xf32>
    %24 = arith.subf %20, %23 : vector<10x10xf32>
    %25 = math.exp %24 : vector<10x10xf32>
    %cst_16 = arith.constant dense<0.000000e+00> : vector<10xf32>
    %26 = vector.multi_reduction <add>, %25, %cst_16 [1] : vector<10x10xf32> to vector<10xf32>
    %27 = vector.shape_cast %26 : vector<10xf32> to vector<10x1xf32>
    %28 = tpu.reciprocal %27 {approx = true} : vector<10x1xf32> -> vector<10x1xf32>
    %29 = vector.broadcast %28 : vector<10x1xf32> to vector<10x10xf32>
    %30 = arith.mulf %25, %29 : vector<10x10xf32>
    %31 = arith.truncf %30 : vector<10x10xf32> to vector<10x10xbf16>
    %32 = arith.truncf %14 : vector<10x16xf32> to vector<10x16xbf16>
    %cst_17 = arith.constant dense<0.000000e+00> : vector<10x16xf32>
    %33 = tpu.matmul %31, %32, %cst_17 {dimension_numbers = #tpu.dot_dimension_numbers<[1], [0], [0], [1], [0, 0, 1, 1], [], []>} : vector<10x10xbf16>, vector<10x16xbf16>, vector<10x16xf32> -> vector<10x16xf32>
    %34 = arith.truncf %33 : vector<10x16xf32> to vector<10x16xbf16>
    %35 = vector.extract_strided_slice %10 {offsets = [0, 0], sizes = [16, 64], strides = [1, 1]} : vector<64x64xbf16> to vector<16x64xbf16>
    %cst_18 = arith.constant dense<0.000000e+00> : vector<10x64xf32>
    %36 = tpu.matmul %34, %35, %cst_18 {dimension_numbers = #tpu.dot_dimension_numbers<[1], [0], [0], [1], [0, 0, 1, 1], [], []>} : vector<10x16xbf16>, vector<16x64xbf16>, vector<10x64xf32> -> vector<10x64xf32>
    %37 = arith.addf %11, %36 : vector<10x64xf32>
    %38 = vector.extract_strided_slice %8 {offsets = [0, 16], sizes = [10, 16], strides = [1, 1]} : vector<10x192xf32> to vector<10x16xf32>
    %39 = vector.extract_strided_slice %8 {offsets = [0, 80], sizes = [10, 16], strides = [1, 1]} : vector<10x192xf32> to vector<10x16xf32>
    %40 = vector.extract_strided_slice %8 {offsets = [0, 144], sizes = [10, 16], strides = [1, 1]} : vector<10x192xf32> to vector<10x16xf32>
    %41 = arith.truncf %38 : vector<10x16xf32> to vector<10x16xbf16>
    %42 = arith.truncf %39 : vector<10x16xf32> to vector<10x16xbf16>
    %cst_19 = arith.constant dense<0.000000e+00> : vector<10x10xf32>
    %43 = tpu.matmul %41, %42, %cst_19 {dimension_numbers = #tpu.dot_dimension_numbers<[1], [1], [0], [0], [0, 0, 1, 0], [], []>} : vector<10x16xbf16>, vector<10x16xbf16>, vector<10x10xf32> -> vector<10x10xf32>
    %c1 = arith.constant 1 : index
    %c0_20 = arith.constant 0 : index
    %c0_21 = arith.constant 0 : index
    %44 = vector.load %arg1[%c1, %c0_20, %c0_21] : memref<4x10x10xf32, #tpu.memory_space<vmem>>, vector<1x10x10xf32>
    %45 = vector.shape_cast %44 : vector<1x10x10xf32> to vector<10x10xf32>
    %46 = arith.addf %43, %45 : vector<10x10xf32>
    %cst_22 = arith.constant dense<0xFF800000> : vector<10xf32>
    %47 = vector.multi_reduction <maximumf>, %46, %cst_22 [1] : vector<10x10xf32> to vector<10xf32>
    %48 = vector.shape_cast %47 : vector<10xf32> to vector<10x1xf32>
    %49 = vector.broadcast %48 : vector<10x1xf32> to vector<10x10xf32>
    %50 = arith.subf %46, %49 : vector<10x10xf32>
    %51 = math.exp %50 : vector<10x10xf32>
    %cst_23 = arith.constant dense<0.000000e+00> : vector<10xf32>
    %52 = vector.multi_reduction <add>, %51, %cst_23 [1] : vector<10x10xf32> to vector<10xf32>
    %53 = vector.shape_cast %52 : vector<10xf32> to vector<10x1xf32>
    %54 = tpu.reciprocal %53 {approx = true} : vector<10x1xf32> -> vector<10x1xf32>
    %55 = vector.broadcast %54 : vector<10x1xf32> to vector<10x10xf32>
    %56 = arith.mulf %51, %55 : vector<10x10xf32>
    %57 = arith.truncf %56 : vector<10x10xf32> to vector<10x10xbf16>
    %58 = arith.truncf %40 : vector<10x16xf32> to vector<10x16xbf16>
    %cst_24 = arith.constant dense<0.000000e+00> : vector<10x16xf32>
    %59 = tpu.matmul %57, %58, %cst_24 {dimension_numbers = #tpu.dot_dimension_numbers<[1], [0], [0], [1], [0, 0, 1, 1], [], []>} : vector<10x10xbf16>, vector<10x16xbf16>, vector<10x16xf32> -> vector<10x16xf32>
    %60 = arith.truncf %59 : vector<10x16xf32> to vector<10x16xbf16>
    %61 = vector.extract_strided_slice %10 {offsets = [16, 0], sizes = [16, 64], strides = [1, 1]} : vector<64x64xbf16> to vector<16x64xbf16>
    %cst_25 = arith.constant dense<0.000000e+00> : vector<10x64xf32>
    %62 = tpu.matmul %60, %61, %cst_25 {dimension_numbers = #tpu.dot_dimension_numbers<[1], [0], [0], [1], [0, 0, 1, 1], [], []>} : vector<10x16xbf16>, vector<16x64xbf16>, vector<10x64xf32> -> vector<10x64xf32>
    %63 = arith.addf %37, %62 : vector<10x64xf32>
    %64 = vector.extract_strided_slice %8 {offsets = [0, 32], sizes = [10, 16], strides = [1, 1]} : vector<10x192xf32> to vector<10x16xf32>
    %65 = vector.extract_strided_slice %8 {offsets = [0, 96], sizes = [10, 16], strides = [1, 1]} : vector<10x192xf32> to vector<10x16xf32>
    %66 = vector.extract_strided_slice %8 {offsets = [0, 160], sizes = [10, 16], strides = [1, 1]} : vector<10x192xf32> to vector<10x16xf32>
    %67 = arith.truncf %64 : vector<10x16xf32> to vector<10x16xbf16>
    %68 = arith.truncf %65 : vector<10x16xf32> to vector<10x16xbf16>
    %cst_26 = arith.constant dense<0.000000e+00> : vector<10x10xf32>
    %69 = tpu.matmul %67, %68, %cst_26 {dimension_numbers = #tpu.dot_dimension_numbers<[1], [1], [0], [0], [0, 0, 1, 0], [], []>} : vector<10x16xbf16>, vector<10x16xbf16>, vector<10x10xf32> -> vector<10x10xf32>
    %c2 = arith.constant 2 : index
    %c0_27 = arith.constant 0 : index
    %c0_28 = arith.constant 0 : index
    %70 = vector.load %arg1[%c2, %c0_27, %c0_28] : memref<4x10x10xf32, #tpu.memory_space<vmem>>, vector<1x10x10xf32>
    %71 = vector.shape_cast %70 : vector<1x10x10xf32> to vector<10x10xf32>
    %72 = arith.addf %69, %71 : vector<10x10xf32>
    %cst_29 = arith.constant dense<0xFF800000> : vector<10xf32>
    %73 = vector.multi_reduction <maximumf>, %72, %cst_29 [1] : vector<10x10xf32> to vector<10xf32>
    %74 = vector.shape_cast %73 : vector<10xf32> to vector<10x1xf32>
    %75 = vector.broadcast %74 : vector<10x1xf32> to vector<10x10xf32>
    %76 = arith.subf %72, %75 : vector<10x10xf32>
    %77 = math.exp %76 : vector<10x10xf32>
    %cst_30 = arith.constant dense<0.000000e+00> : vector<10xf32>
    %78 = vector.multi_reduction <add>, %77, %cst_30 [1] : vector<10x10xf32> to vector<10xf32>
    %79 = vector.shape_cast %78 : vector<10xf32> to vector<10x1xf32>
    %80 = tpu.reciprocal %79 {approx = true} : vector<10x1xf32> -> vector<10x1xf32>
    %81 = vector.broadcast %80 : vector<10x1xf32> to vector<10x10xf32>
    %82 = arith.mulf %77, %81 : vector<10x10xf32>
    %83 = arith.truncf %82 : vector<10x10xf32> to vector<10x10xbf16>
    %84 = arith.truncf %66 : vector<10x16xf32> to vector<10x16xbf16>
    %cst_31 = arith.constant dense<0.000000e+00> : vector<10x16xf32>
    %85 = tpu.matmul %83, %84, %cst_31 {dimension_numbers = #tpu.dot_dimension_numbers<[1], [0], [0], [1], [0, 0, 1, 1], [], []>} : vector<10x10xbf16>, vector<10x16xbf16>, vector<10x16xf32> -> vector<10x16xf32>
    %86 = arith.truncf %85 : vector<10x16xf32> to vector<10x16xbf16>
    %87 = vector.extract_strided_slice %10 {offsets = [32, 0], sizes = [16, 64], strides = [1, 1]} : vector<64x64xbf16> to vector<16x64xbf16>
    %cst_32 = arith.constant dense<0.000000e+00> : vector<10x64xf32>
    %88 = tpu.matmul %86, %87, %cst_32 {dimension_numbers = #tpu.dot_dimension_numbers<[1], [0], [0], [1], [0, 0, 1, 1], [], []>} : vector<10x16xbf16>, vector<16x64xbf16>, vector<10x64xf32> -> vector<10x64xf32>
    %89 = arith.addf %63, %88 : vector<10x64xf32>
    %90 = vector.extract_strided_slice %8 {offsets = [0, 48], sizes = [10, 16], strides = [1, 1]} : vector<10x192xf32> to vector<10x16xf32>
    %91 = vector.extract_strided_slice %8 {offsets = [0, 112], sizes = [10, 16], strides = [1, 1]} : vector<10x192xf32> to vector<10x16xf32>
    %92 = vector.extract_strided_slice %8 {offsets = [0, 176], sizes = [10, 16], strides = [1, 1]} : vector<10x192xf32> to vector<10x16xf32>
    %93 = arith.truncf %90 : vector<10x16xf32> to vector<10x16xbf16>
    %94 = arith.truncf %91 : vector<10x16xf32> to vector<10x16xbf16>
    %cst_33 = arith.constant dense<0.000000e+00> : vector<10x10xf32>
    %95 = tpu.matmul %93, %94, %cst_33 {dimension_numbers = #tpu.dot_dimension_numbers<[1], [1], [0], [0], [0, 0, 1, 0], [], []>} : vector<10x16xbf16>, vector<10x16xbf16>, vector<10x10xf32> -> vector<10x10xf32>
    %c3 = arith.constant 3 : index
    %c0_34 = arith.constant 0 : index
    %c0_35 = arith.constant 0 : index
    %96 = vector.load %arg1[%c3, %c0_34, %c0_35] : memref<4x10x10xf32, #tpu.memory_space<vmem>>, vector<1x10x10xf32>
    %97 = vector.shape_cast %96 : vector<1x10x10xf32> to vector<10x10xf32>
    %98 = arith.addf %95, %97 : vector<10x10xf32>
    %cst_36 = arith.constant dense<0xFF800000> : vector<10xf32>
    %99 = vector.multi_reduction <maximumf>, %98, %cst_36 [1] : vector<10x10xf32> to vector<10xf32>
    %100 = vector.shape_cast %99 : vector<10xf32> to vector<10x1xf32>
    %101 = vector.broadcast %100 : vector<10x1xf32> to vector<10x10xf32>
    %102 = arith.subf %98, %101 : vector<10x10xf32>
    %103 = math.exp %102 : vector<10x10xf32>
    %cst_37 = arith.constant dense<0.000000e+00> : vector<10xf32>
    %104 = vector.multi_reduction <add>, %103, %cst_37 [1] : vector<10x10xf32> to vector<10xf32>
    %105 = vector.shape_cast %104 : vector<10xf32> to vector<10x1xf32>
    %106 = tpu.reciprocal %105 {approx = true} : vector<10x1xf32> -> vector<10x1xf32>
    %107 = vector.broadcast %106 : vector<10x1xf32> to vector<10x10xf32>
    %108 = arith.mulf %103, %107 : vector<10x10xf32>
    %109 = arith.truncf %108 : vector<10x10xf32> to vector<10x10xbf16>
    %110 = arith.truncf %92 : vector<10x16xf32> to vector<10x16xbf16>
    %cst_38 = arith.constant dense<0.000000e+00> : vector<10x16xf32>
    %111 = tpu.matmul %109, %110, %cst_38 {dimension_numbers = #tpu.dot_dimension_numbers<[1], [0], [0], [1], [0, 0, 1, 1], [], []>} : vector<10x10xbf16>, vector<10x16xbf16>, vector<10x16xf32> -> vector<10x16xf32>
    %112 = arith.truncf %111 : vector<10x16xf32> to vector<10x16xbf16>
    %113 = vector.extract_strided_slice %10 {offsets = [48, 0], sizes = [16, 64], strides = [1, 1]} : vector<64x64xbf16> to vector<16x64xbf16>
    %cst_39 = arith.constant dense<0.000000e+00> : vector<10x64xf32>
    %114 = tpu.matmul %112, %113, %cst_39 {dimension_numbers = #tpu.dot_dimension_numbers<[1], [0], [0], [1], [0, 0, 1, 1], [], []>} : vector<10x16xbf16>, vector<16x64xbf16>, vector<10x64xf32> -> vector<10x64xf32>
    %115 = arith.addf %89, %114 : vector<10x64xf32>
    %c0_40 = arith.constant 0 : index
    %c0_41 = arith.constant 0 : index
    %c0_42 = arith.constant 0 : index
    %116 = vector.load %arg5[%c0_40, %c0_41, %c0_42] : memref<2x1x64xf32, #tpu.memory_space<vmem>>, vector<1x1x64xf32>
    %117 = vector.shape_cast %116 : vector<1x1x64xf32> to vector<1x64xf32>
    %118 = vector.broadcast %117 : vector<1x64xf32> to vector<10x64xf32>
    %119 = arith.addf %115, %118 : vector<10x64xf32>
    %120 = arith.addf %0, %119 : vector<10x64xf32>
    %c0_43 = arith.constant 0 : index
    %c0_44 = arith.constant 0 : index
    %c0_45 = arith.constant 0 : index
    %121 = vector.load %arg6[%c0_43, %c0_44, %c0_45] : memref<2x1x64xf32, #tpu.memory_space<vmem>>, vector<1x1x64xf32>
    %122 = vector.shape_cast %121 : vector<1x1x64xf32> to vector<1x64xf32>
    %c0_46 = arith.constant 0 : index
    %c0_47 = arith.constant 0 : index
    %c0_48 = arith.constant 0 : index
    %123 = vector.load %arg7[%c0_46, %c0_47, %c0_48] : memref<2x1x64xf32, #tpu.memory_space<vmem>>, vector<1x1x64xf32>
    %124 = vector.shape_cast %123 : vector<1x1x64xf32> to vector<1x64xf32>
    %cst_49 = arith.constant dense<0.000000e+00> : vector<10xf32>
    %125 = vector.multi_reduction <add>, %120, %cst_49 [1] : vector<10x64xf32> to vector<10xf32>
    %126 = vector.shape_cast %125 : vector<10xf32> to vector<10x1xf32>
    %cst_50 = arith.constant 6.400000e+01 : f32
    %127 = vector.broadcast %cst_50 : f32 to vector<10x1xf32>
    %128 = arith.divf %126, %127 : vector<10x1xf32>
    %129 = vector.broadcast %128 : vector<10x1xf32> to vector<10x64xf32>
    %130 = arith.subf %120, %129 : vector<10x64xf32>
    %131 = arith.mulf %130, %130 : vector<10x64xf32>
    %cst_51 = arith.constant dense<0.000000e+00> : vector<10xf32>
    %132 = vector.multi_reduction <add>, %131, %cst_51 [1] : vector<10x64xf32> to vector<10xf32>
    %133 = vector.shape_cast %132 : vector<10xf32> to vector<10x1xf32>
    %cst_52 = arith.constant 6.400000e+01 : f32
    %134 = vector.broadcast %cst_52 : f32 to vector<10x1xf32>
    %135 = arith.divf %133, %134 : vector<10x1xf32>
    %136 = vector.broadcast %128 : vector<10x1xf32> to vector<10x64xf32>
    %137 = arith.subf %120, %136 : vector<10x64xf32>
    %cst_53 = arith.constant 9.99999974E-6 : f32
    %138 = vector.broadcast %cst_53 : f32 to vector<10x1xf32>
    %139 = arith.addf %135, %138 : vector<10x1xf32>
    %140 = math.rsqrt %139 : vector<10x1xf32>
    %141 = vector.broadcast %140 : vector<10x1xf32> to vector<10x64xf32>
    %142 = arith.mulf %137, %141 : vector<10x64xf32>
    %143 = vector.broadcast %122 : vector<1x64xf32> to vector<10x64xf32>
    %144 = arith.mulf %142, %143 : vector<10x64xf32>
    %145 = vector.broadcast %124 : vector<1x64xf32> to vector<10x64xf32>
    %146 = arith.addf %144, %145 : vector<10x64xf32>
    %147 = arith.truncf %146 : vector<10x64xf32> to vector<10x64xbf16>
    %c0_54 = arith.constant 0 : index
    %c0_55 = arith.constant 0 : index
    %c0_56 = arith.constant 0 : index
    %148 = vector.load %arg8[%c0_54, %c0_55, %c0_56] : memref<2x64x128xbf16, #tpu.memory_space<vmem>>, vector<1x64x128xbf16>
    %149 = vector.shape_cast %148 : vector<1x64x128xbf16> to vector<64x128xbf16>
    %cst_57 = arith.constant dense<0.000000e+00> : vector<10x128xf32>
    %150 = tpu.matmul %147, %149, %cst_57 {dimension_numbers = #tpu.dot_dimension_numbers<[1], [0], [0], [1], [0, 0, 1, 1], [], []>} : vector<10x64xbf16>, vector<64x128xbf16>, vector<10x128xf32> -> vector<10x128xf32>
    %c0_58 = arith.constant 0 : index
    %c0_59 = arith.constant 0 : index
    %c0_60 = arith.constant 0 : index
    %151 = vector.load %arg9[%c0_58, %c0_59, %c0_60] : memref<2x1x128xf32, #tpu.memory_space<vmem>>, vector<1x1x128xf32>
    %152 = vector.shape_cast %151 : vector<1x1x128xf32> to vector<1x128xf32>
    %153 = vector.broadcast %152 : vector<1x128xf32> to vector<10x128xf32>
    %154 = arith.addf %150, %153 : vector<10x128xf32>
    %cst_61 = arith.constant 5.000000e-01 : f32
    %155 = vector.broadcast %cst_61 : f32 to vector<10x128xf32>
    %156 = arith.mulf %155, %154 : vector<10x128xf32>
    %cst_62 = arith.constant 4.471500e-02 : f32
    %157 = vector.broadcast %cst_62 : f32 to vector<10x128xf32>
    %158 = arith.mulf %157, %154 : vector<10x128xf32>
    %159 = arith.mulf %158, %154 : vector<10x128xf32>
    %160 = arith.mulf %159, %154 : vector<10x128xf32>
    %161 = arith.addf %154, %160 : vector<10x128xf32>
    %cst_63 = arith.constant 0.797884583 : f32
    %162 = vector.broadcast %cst_63 : f32 to vector<10x128xf32>
    %163 = arith.mulf %162, %161 : vector<10x128xf32>
    %164 = math.tanh %163 : vector<10x128xf32>
    %cst_64 = arith.constant 1.000000e+00 : f32
    %165 = vector.broadcast %cst_64 : f32 to vector<10x128xf32>
    %166 = arith.addf %165, %164 : vector<10x128xf32>
    %167 = arith.mulf %156, %166 : vector<10x128xf32>
    %168 = arith.truncf %167 : vector<10x128xf32> to vector<10x128xbf16>
    %c0_65 = arith.constant 0 : index
    %c0_66 = arith.constant 0 : index
    %c0_67 = arith.constant 0 : index
    %169 = vector.load %arg10[%c0_65, %c0_66, %c0_67] : memref<2x128x64xbf16, #tpu.memory_space<vmem>>, vector<1x128x64xbf16>
    %170 = vector.shape_cast %169 : vector<1x128x64xbf16> to vector<128x64xbf16>
    %cst_68 = arith.constant dense<0.000000e+00> : vector<10x64xf32>
    %171 = tpu.matmul %168, %170, %cst_68 {dimension_numbers = #tpu.dot_dimension_numbers<[1], [0], [0], [1], [0, 0, 1, 1], [], []>} : vector<10x128xbf16>, vector<128x64xbf16>, vector<10x64xf32> -> vector<10x64xf32>
    %c0_69 = arith.constant 0 : index
    %c0_70 = arith.constant 0 : index
    %c0_71 = arith.constant 0 : index
    %172 = vector.load %arg11[%c0_69, %c0_70, %c0_71] : memref<2x1x64xf32, #tpu.memory_space<vmem>>, vector<1x1x64xf32>
    %173 = vector.shape_cast %172 : vector<1x1x64xf32> to vector<1x64xf32>
    %174 = vector.broadcast %173 : vector<1x64xf32> to vector<10x64xf32>
    %175 = arith.addf %171, %174 : vector<10x64xf32>
    %176 = arith.addf %146, %175 : vector<10x64xf32>
    %c0_72 = arith.constant 0 : index
    %c0_73 = arith.constant 0 : index
    %c0_74 = arith.constant 0 : index
    %177 = vector.load %arg12[%c0_72, %c0_73, %c0_74] : memref<2x1x64xf32, #tpu.memory_space<vmem>>, vector<1x1x64xf32>
    %178 = vector.shape_cast %177 : vector<1x1x64xf32> to vector<1x64xf32>
    %c0_75 = arith.constant 0 : index
    %c0_76 = arith.constant 0 : index
    %c0_77 = arith.constant 0 : index
    %179 = vector.load %arg13[%c0_75, %c0_76, %c0_77] : memref<2x1x64xf32, #tpu.memory_space<vmem>>, vector<1x1x64xf32>
    %180 = vector.shape_cast %179 : vector<1x1x64xf32> to vector<1x64xf32>
    %cst_78 = arith.constant dense<0.000000e+00> : vector<10xf32>
    %181 = vector.multi_reduction <add>, %176, %cst_78 [1] : vector<10x64xf32> to vector<10xf32>
    %182 = vector.shape_cast %181 : vector<10xf32> to vector<10x1xf32>
    %cst_79 = arith.constant 6.400000e+01 : f32
    %183 = vector.broadcast %cst_79 : f32 to vector<10x1xf32>
    %184 = arith.divf %182, %183 : vector<10x1xf32>
    %185 = vector.broadcast %184 : vector<10x1xf32> to vector<10x64xf32>
    %186 = arith.subf %176, %185 : vector<10x64xf32>
    %187 = arith.mulf %186, %186 : vector<10x64xf32>
    %cst_80 = arith.constant dense<0.000000e+00> : vector<10xf32>
    %188 = vector.multi_reduction <add>, %187, %cst_80 [1] : vector<10x64xf32> to vector<10xf32>
    %189 = vector.shape_cast %188 : vector<10xf32> to vector<10x1xf32>
    %cst_81 = arith.constant 6.400000e+01 : f32
    %190 = vector.broadcast %cst_81 : f32 to vector<10x1xf32>
    %191 = arith.divf %189, %190 : vector<10x1xf32>
    %192 = vector.broadcast %184 : vector<10x1xf32> to vector<10x64xf32>
    %193 = arith.subf %176, %192 : vector<10x64xf32>
    %cst_82 = arith.constant 9.99999974E-6 : f32
    %194 = vector.broadcast %cst_82 : f32 to vector<10x1xf32>
    %195 = arith.addf %191, %194 : vector<10x1xf32>
    %196 = math.rsqrt %195 : vector<10x1xf32>
    %197 = vector.broadcast %196 : vector<10x1xf32> to vector<10x64xf32>
    %198 = arith.mulf %193, %197 : vector<10x64xf32>
    %199 = vector.broadcast %178 : vector<1x64xf32> to vector<10x64xf32>
    %200 = arith.mulf %198, %199 : vector<10x64xf32>
    %201 = vector.broadcast %180 : vector<1x64xf32> to vector<10x64xf32>
    %202 = arith.addf %200, %201 : vector<10x64xf32>
    %203 = arith.truncf %202 : vector<10x64xf32> to vector<10x64xbf16>
    %c1_83 = arith.constant 1 : index
    %c0_84 = arith.constant 0 : index
    %c0_85 = arith.constant 0 : index
    %204 = vector.load %arg2[%c1_83, %c0_84, %c0_85] : memref<2x64x192xbf16, #tpu.memory_space<vmem>>, vector<1x64x192xbf16>
    %205 = vector.shape_cast %204 : vector<1x64x192xbf16> to vector<64x192xbf16>
    %cst_86 = arith.constant dense<0.000000e+00> : vector<10x192xf32>
    %206 = tpu.matmul %203, %205, %cst_86 {dimension_numbers = #tpu.dot_dimension_numbers<[1], [0], [0], [1], [0, 0, 1, 1], [], []>} : vector<10x64xbf16>, vector<64x192xbf16>, vector<10x192xf32> -> vector<10x192xf32>
    %c1_87 = arith.constant 1 : index
    %c0_88 = arith.constant 0 : index
    %c0_89 = arith.constant 0 : index
    %207 = vector.load %arg3[%c1_87, %c0_88, %c0_89] : memref<2x1x192xf32, #tpu.memory_space<vmem>>, vector<1x1x192xf32>
    %208 = vector.shape_cast %207 : vector<1x1x192xf32> to vector<1x192xf32>
    %209 = vector.broadcast %208 : vector<1x192xf32> to vector<10x192xf32>
    %210 = arith.addf %206, %209 : vector<10x192xf32>
    %c1_90 = arith.constant 1 : index
    %c0_91 = arith.constant 0 : index
    %c0_92 = arith.constant 0 : index
    %211 = vector.load %arg4[%c1_90, %c0_91, %c0_92] : memref<2x64x64xbf16, #tpu.memory_space<vmem>>, vector<1x64x64xbf16>
    %212 = vector.shape_cast %211 : vector<1x64x64xbf16> to vector<64x64xbf16>
    %cst_93 = arith.constant 0.000000e+00 : f32
    %213 = vector.broadcast %cst_93 : f32 to vector<10x64xf32>
    %214 = vector.extract_strided_slice %210 {offsets = [0, 0], sizes = [10, 16], strides = [1, 1]} : vector<10x192xf32> to vector<10x16xf32>
    %215 = vector.extract_strided_slice %210 {offsets = [0, 64], sizes = [10, 16], strides = [1, 1]} : vector<10x192xf32> to vector<10x16xf32>
    %216 = vector.extract_strided_slice %210 {offsets = [0, 128], sizes = [10, 16], strides = [1, 1]} : vector<10x192xf32> to vector<10x16xf32>
    %217 = arith.truncf %214 : vector<10x16xf32> to vector<10x16xbf16>
    %218 = arith.truncf %215 : vector<10x16xf32> to vector<10x16xbf16>
    %cst_94 = arith.constant dense<0.000000e+00> : vector<10x10xf32>
    %219 = tpu.matmul %217, %218, %cst_94 {dimension_numbers = #tpu.dot_dimension_numbers<[1], [1], [0], [0], [0, 0, 1, 0], [], []>} : vector<10x16xbf16>, vector<10x16xbf16>, vector<10x10xf32> -> vector<10x10xf32>
    %c0_95 = arith.constant 0 : index
    %c0_96 = arith.constant 0 : index
    %c0_97 = arith.constant 0 : index
    %220 = vector.load %arg1[%c0_95, %c0_96, %c0_97] : memref<4x10x10xf32, #tpu.memory_space<vmem>>, vector<1x10x10xf32>
    %221 = vector.shape_cast %220 : vector<1x10x10xf32> to vector<10x10xf32>
    %222 = arith.addf %219, %221 : vector<10x10xf32>
    %cst_98 = arith.constant dense<0xFF800000> : vector<10xf32>
    %223 = vector.multi_reduction <maximumf>, %222, %cst_98 [1] : vector<10x10xf32> to vector<10xf32>
    %224 = vector.shape_cast %223 : vector<10xf32> to vector<10x1xf32>
    %225 = vector.broadcast %224 : vector<10x1xf32> to vector<10x10xf32>
    %226 = arith.subf %222, %225 : vector<10x10xf32>
    %227 = math.exp %226 : vector<10x10xf32>
    %cst_99 = arith.constant dense<0.000000e+00> : vector<10xf32>
    %228 = vector.multi_reduction <add>, %227, %cst_99 [1] : vector<10x10xf32> to vector<10xf32>
    %229 = vector.shape_cast %228 : vector<10xf32> to vector<10x1xf32>
    %230 = tpu.reciprocal %229 {approx = true} : vector<10x1xf32> -> vector<10x1xf32>
    %231 = vector.broadcast %230 : vector<10x1xf32> to vector<10x10xf32>
    %232 = arith.mulf %227, %231 : vector<10x10xf32>
    %233 = arith.truncf %232 : vector<10x10xf32> to vector<10x10xbf16>
    %234 = arith.truncf %216 : vector<10x16xf32> to vector<10x16xbf16>
    %cst_100 = arith.constant dense<0.000000e+00> : vector<10x16xf32>
    %235 = tpu.matmul %233, %234, %cst_100 {dimension_numbers = #tpu.dot_dimension_numbers<[1], [0], [0], [1], [0, 0, 1, 1], [], []>} : vector<10x10xbf16>, vector<10x16xbf16>, vector<10x16xf32> -> vector<10x16xf32>
    %236 = arith.truncf %235 : vector<10x16xf32> to vector<10x16xbf16>
    %237 = vector.extract_strided_slice %212 {offsets = [0, 0], sizes = [16, 64], strides = [1, 1]} : vector<64x64xbf16> to vector<16x64xbf16>
    %cst_101 = arith.constant dense<0.000000e+00> : vector<10x64xf32>
    %238 = tpu.matmul %236, %237, %cst_101 {dimension_numbers = #tpu.dot_dimension_numbers<[1], [0], [0], [1], [0, 0, 1, 1], [], []>} : vector<10x16xbf16>, vector<16x64xbf16>, vector<10x64xf32> -> vector<10x64xf32>
    %239 = arith.addf %213, %238 : vector<10x64xf32>
    %240 = vector.extract_strided_slice %210 {offsets = [0, 16], sizes = [10, 16], strides = [1, 1]} : vector<10x192xf32> to vector<10x16xf32>
    %241 = vector.extract_strided_slice %210 {offsets = [0, 80], sizes = [10, 16], strides = [1, 1]} : vector<10x192xf32> to vector<10x16xf32>
    %242 = vector.extract_strided_slice %210 {offsets = [0, 144], sizes = [10, 16], strides = [1, 1]} : vector<10x192xf32> to vector<10x16xf32>
    %243 = arith.truncf %240 : vector<10x16xf32> to vector<10x16xbf16>
    %244 = arith.truncf %241 : vector<10x16xf32> to vector<10x16xbf16>
    %cst_102 = arith.constant dense<0.000000e+00> : vector<10x10xf32>
    %245 = tpu.matmul %243, %244, %cst_102 {dimension_numbers = #tpu.dot_dimension_numbers<[1], [1], [0], [0], [0, 0, 1, 0], [], []>} : vector<10x16xbf16>, vector<10x16xbf16>, vector<10x10xf32> -> vector<10x10xf32>
    %c1_103 = arith.constant 1 : index
    %c0_104 = arith.constant 0 : index
    %c0_105 = arith.constant 0 : index
    %246 = vector.load %arg1[%c1_103, %c0_104, %c0_105] : memref<4x10x10xf32, #tpu.memory_space<vmem>>, vector<1x10x10xf32>
    %247 = vector.shape_cast %246 : vector<1x10x10xf32> to vector<10x10xf32>
    %248 = arith.addf %245, %247 : vector<10x10xf32>
    %cst_106 = arith.constant dense<0xFF800000> : vector<10xf32>
    %249 = vector.multi_reduction <maximumf>, %248, %cst_106 [1] : vector<10x10xf32> to vector<10xf32>
    %250 = vector.shape_cast %249 : vector<10xf32> to vector<10x1xf32>
    %251 = vector.broadcast %250 : vector<10x1xf32> to vector<10x10xf32>
    %252 = arith.subf %248, %251 : vector<10x10xf32>
    %253 = math.exp %252 : vector<10x10xf32>
    %cst_107 = arith.constant dense<0.000000e+00> : vector<10xf32>
    %254 = vector.multi_reduction <add>, %253, %cst_107 [1] : vector<10x10xf32> to vector<10xf32>
    %255 = vector.shape_cast %254 : vector<10xf32> to vector<10x1xf32>
    %256 = tpu.reciprocal %255 {approx = true} : vector<10x1xf32> -> vector<10x1xf32>
    %257 = vector.broadcast %256 : vector<10x1xf32> to vector<10x10xf32>
    %258 = arith.mulf %253, %257 : vector<10x10xf32>
    %259 = arith.truncf %258 : vector<10x10xf32> to vector<10x10xbf16>
    %260 = arith.truncf %242 : vector<10x16xf32> to vector<10x16xbf16>
    %cst_108 = arith.constant dense<0.000000e+00> : vector<10x16xf32>
    %261 = tpu.matmul %259, %260, %cst_108 {dimension_numbers = #tpu.dot_dimension_numbers<[1], [0], [0], [1], [0, 0, 1, 1], [], []>} : vector<10x10xbf16>, vector<10x16xbf16>, vector<10x16xf32> -> vector<10x16xf32>
    %262 = arith.truncf %261 : vector<10x16xf32> to vector<10x16xbf16>
    %263 = vector.extract_strided_slice %212 {offsets = [16, 0], sizes = [16, 64], strides = [1, 1]} : vector<64x64xbf16> to vector<16x64xbf16>
    %cst_109 = arith.constant dense<0.000000e+00> : vector<10x64xf32>
    %264 = tpu.matmul %262, %263, %cst_109 {dimension_numbers = #tpu.dot_dimension_numbers<[1], [0], [0], [1], [0, 0, 1, 1], [], []>} : vector<10x16xbf16>, vector<16x64xbf16>, vector<10x64xf32> -> vector<10x64xf32>
    %265 = arith.addf %239, %264 : vector<10x64xf32>
    %266 = vector.extract_strided_slice %210 {offsets = [0, 32], sizes = [10, 16], strides = [1, 1]} : vector<10x192xf32> to vector<10x16xf32>
    %267 = vector.extract_strided_slice %210 {offsets = [0, 96], sizes = [10, 16], strides = [1, 1]} : vector<10x192xf32> to vector<10x16xf32>
    %268 = vector.extract_strided_slice %210 {offsets = [0, 160], sizes = [10, 16], strides = [1, 1]} : vector<10x192xf32> to vector<10x16xf32>
    %269 = arith.truncf %266 : vector<10x16xf32> to vector<10x16xbf16>
    %270 = arith.truncf %267 : vector<10x16xf32> to vector<10x16xbf16>
    %cst_110 = arith.constant dense<0.000000e+00> : vector<10x10xf32>
    %271 = tpu.matmul %269, %270, %cst_110 {dimension_numbers = #tpu.dot_dimension_numbers<[1], [1], [0], [0], [0, 0, 1, 0], [], []>} : vector<10x16xbf16>, vector<10x16xbf16>, vector<10x10xf32> -> vector<10x10xf32>
    %c2_111 = arith.constant 2 : index
    %c0_112 = arith.constant 0 : index
    %c0_113 = arith.constant 0 : index
    %272 = vector.load %arg1[%c2_111, %c0_112, %c0_113] : memref<4x10x10xf32, #tpu.memory_space<vmem>>, vector<1x10x10xf32>
    %273 = vector.shape_cast %272 : vector<1x10x10xf32> to vector<10x10xf32>
    %274 = arith.addf %271, %273 : vector<10x10xf32>
    %cst_114 = arith.constant dense<0xFF800000> : vector<10xf32>
    %275 = vector.multi_reduction <maximumf>, %274, %cst_114 [1] : vector<10x10xf32> to vector<10xf32>
    %276 = vector.shape_cast %275 : vector<10xf32> to vector<10x1xf32>
    %277 = vector.broadcast %276 : vector<10x1xf32> to vector<10x10xf32>
    %278 = arith.subf %274, %277 : vector<10x10xf32>
    %279 = math.exp %278 : vector<10x10xf32>
    %cst_115 = arith.constant dense<0.000000e+00> : vector<10xf32>
    %280 = vector.multi_reduction <add>, %279, %cst_115 [1] : vector<10x10xf32> to vector<10xf32>
    %281 = vector.shape_cast %280 : vector<10xf32> to vector<10x1xf32>
    %282 = tpu.reciprocal %281 {approx = true} : vector<10x1xf32> -> vector<10x1xf32>
    %283 = vector.broadcast %282 : vector<10x1xf32> to vector<10x10xf32>
    %284 = arith.mulf %279, %283 : vector<10x10xf32>
    %285 = arith.truncf %284 : vector<10x10xf32> to vector<10x10xbf16>
    %286 = arith.truncf %268 : vector<10x16xf32> to vector<10x16xbf16>
    %cst_116 = arith.constant dense<0.000000e+00> : vector<10x16xf32>
    %287 = tpu.matmul %285, %286, %cst_116 {dimension_numbers = #tpu.dot_dimension_numbers<[1], [0], [0], [1], [0, 0, 1, 1], [], []>} : vector<10x10xbf16>, vector<10x16xbf16>, vector<10x16xf32> -> vector<10x16xf32>
    %288 = arith.truncf %287 : vector<10x16xf32> to vector<10x16xbf16>
    %289 = vector.extract_strided_slice %212 {offsets = [32, 0], sizes = [16, 64], strides = [1, 1]} : vector<64x64xbf16> to vector<16x64xbf16>
    %cst_117 = arith.constant dense<0.000000e+00> : vector<10x64xf32>
    %290 = tpu.matmul %288, %289, %cst_117 {dimension_numbers = #tpu.dot_dimension_numbers<[1], [0], [0], [1], [0, 0, 1, 1], [], []>} : vector<10x16xbf16>, vector<16x64xbf16>, vector<10x64xf32> -> vector<10x64xf32>
    %291 = arith.addf %265, %290 : vector<10x64xf32>
    %292 = vector.extract_strided_slice %210 {offsets = [0, 48], sizes = [10, 16], strides = [1, 1]} : vector<10x192xf32> to vector<10x16xf32>
    %293 = vector.extract_strided_slice %210 {offsets = [0, 112], sizes = [10, 16], strides = [1, 1]} : vector<10x192xf32> to vector<10x16xf32>
    %294 = vector.extract_strided_slice %210 {offsets = [0, 176], sizes = [10, 16], strides = [1, 1]} : vector<10x192xf32> to vector<10x16xf32>
    %295 = arith.truncf %292 : vector<10x16xf32> to vector<10x16xbf16>
    %296 = arith.truncf %293 : vector<10x16xf32> to vector<10x16xbf16>
    %cst_118 = arith.constant dense<0.000000e+00> : vector<10x10xf32>
    %297 = tpu.matmul %295, %296, %cst_118 {dimension_numbers = #tpu.dot_dimension_numbers<[1], [1], [0], [0], [0, 0, 1, 0], [], []>} : vector<10x16xbf16>, vector<10x16xbf16>, vector<10x10xf32> -> vector<10x10xf32>
    %c3_119 = arith.constant 3 : index
    %c0_120 = arith.constant 0 : index
    %c0_121 = arith.constant 0 : index
    %298 = vector.load %arg1[%c3_119, %c0_120, %c0_121] : memref<4x10x10xf32, #tpu.memory_space<vmem>>, vector<1x10x10xf32>
    %299 = vector.shape_cast %298 : vector<1x10x10xf32> to vector<10x10xf32>
    %300 = arith.addf %297, %299 : vector<10x10xf32>
    %cst_122 = arith.constant dense<0xFF800000> : vector<10xf32>
    %301 = vector.multi_reduction <maximumf>, %300, %cst_122 [1] : vector<10x10xf32> to vector<10xf32>
    %302 = vector.shape_cast %301 : vector<10xf32> to vector<10x1xf32>
    %303 = vector.broadcast %302 : vector<10x1xf32> to vector<10x10xf32>
    %304 = arith.subf %300, %303 : vector<10x10xf32>
    %305 = math.exp %304 : vector<10x10xf32>
    %cst_123 = arith.constant dense<0.000000e+00> : vector<10xf32>
    %306 = vector.multi_reduction <add>, %305, %cst_123 [1] : vector<10x10xf32> to vector<10xf32>
    %307 = vector.shape_cast %306 : vector<10xf32> to vector<10x1xf32>
    %308 = tpu.reciprocal %307 {approx = true} : vector<10x1xf32> -> vector<10x1xf32>
    %309 = vector.broadcast %308 : vector<10x1xf32> to vector<10x10xf32>
    %310 = arith.mulf %305, %309 : vector<10x10xf32>
    %311 = arith.truncf %310 : vector<10x10xf32> to vector<10x10xbf16>
    %312 = arith.truncf %294 : vector<10x16xf32> to vector<10x16xbf16>
    %cst_124 = arith.constant dense<0.000000e+00> : vector<10x16xf32>
    %313 = tpu.matmul %311, %312, %cst_124 {dimension_numbers = #tpu.dot_dimension_numbers<[1], [0], [0], [1], [0, 0, 1, 1], [], []>} : vector<10x10xbf16>, vector<10x16xbf16>, vector<10x16xf32> -> vector<10x16xf32>
    %314 = arith.truncf %313 : vector<10x16xf32> to vector<10x16xbf16>
    %315 = vector.extract_strided_slice %212 {offsets = [48, 0], sizes = [16, 64], strides = [1, 1]} : vector<64x64xbf16> to vector<16x64xbf16>
    %cst_125 = arith.constant dense<0.000000e+00> : vector<10x64xf32>
    %316 = tpu.matmul %314, %315, %cst_125 {dimension_numbers = #tpu.dot_dimension_numbers<[1], [0], [0], [1], [0, 0, 1, 1], [], []>} : vector<10x16xbf16>, vector<16x64xbf16>, vector<10x64xf32> -> vector<10x64xf32>
    %317 = arith.addf %291, %316 : vector<10x64xf32>
    %c1_126 = arith.constant 1 : index
    %c0_127 = arith.constant 0 : index
    %c0_128 = arith.constant 0 : index
    %318 = vector.load %arg5[%c1_126, %c0_127, %c0_128] : memref<2x1x64xf32, #tpu.memory_space<vmem>>, vector<1x1x64xf32>
    %319 = vector.shape_cast %318 : vector<1x1x64xf32> to vector<1x64xf32>
    %320 = vector.broadcast %319 : vector<1x64xf32> to vector<10x64xf32>
    %321 = arith.addf %317, %320 : vector<10x64xf32>
    %322 = arith.addf %202, %321 : vector<10x64xf32>
    %c1_129 = arith.constant 1 : index
    %c0_130 = arith.constant 0 : index
    %c0_131 = arith.constant 0 : index
    %323 = vector.load %arg6[%c1_129, %c0_130, %c0_131] : memref<2x1x64xf32, #tpu.memory_space<vmem>>, vector<1x1x64xf32>
    %324 = vector.shape_cast %323 : vector<1x1x64xf32> to vector<1x64xf32>
    %c1_132 = arith.constant 1 : index
    %c0_133 = arith.constant 0 : index
    %c0_134 = arith.constant 0 : index
    %325 = vector.load %arg7[%c1_132, %c0_133, %c0_134] : memref<2x1x64xf32, #tpu.memory_space<vmem>>, vector<1x1x64xf32>
    %326 = vector.shape_cast %325 : vector<1x1x64xf32> to vector<1x64xf32>
    %cst_135 = arith.constant dense<0.000000e+00> : vector<10xf32>
    %327 = vector.multi_reduction <add>, %322, %cst_135 [1] : vector<10x64xf32> to vector<10xf32>
    %328 = vector.shape_cast %327 : vector<10xf32> to vector<10x1xf32>
    %cst_136 = arith.constant 6.400000e+01 : f32
    %329 = vector.broadcast %cst_136 : f32 to vector<10x1xf32>
    %330 = arith.divf %328, %329 : vector<10x1xf32>
    %331 = vector.broadcast %330 : vector<10x1xf32> to vector<10x64xf32>
    %332 = arith.subf %322, %331 : vector<10x64xf32>
    %333 = arith.mulf %332, %332 : vector<10x64xf32>
    %cst_137 = arith.constant dense<0.000000e+00> : vector<10xf32>
    %334 = vector.multi_reduction <add>, %333, %cst_137 [1] : vector<10x64xf32> to vector<10xf32>
    %335 = vector.shape_cast %334 : vector<10xf32> to vector<10x1xf32>
    %cst_138 = arith.constant 6.400000e+01 : f32
    %336 = vector.broadcast %cst_138 : f32 to vector<10x1xf32>
    %337 = arith.divf %335, %336 : vector<10x1xf32>
    %338 = vector.broadcast %330 : vector<10x1xf32> to vector<10x64xf32>
    %339 = arith.subf %322, %338 : vector<10x64xf32>
    %cst_139 = arith.constant 9.99999974E-6 : f32
    %340 = vector.broadcast %cst_139 : f32 to vector<10x1xf32>
    %341 = arith.addf %337, %340 : vector<10x1xf32>
    %342 = math.rsqrt %341 : vector<10x1xf32>
    %343 = vector.broadcast %342 : vector<10x1xf32> to vector<10x64xf32>
    %344 = arith.mulf %339, %343 : vector<10x64xf32>
    %345 = vector.broadcast %324 : vector<1x64xf32> to vector<10x64xf32>
    %346 = arith.mulf %344, %345 : vector<10x64xf32>
    %347 = vector.broadcast %326 : vector<1x64xf32> to vector<10x64xf32>
    %348 = arith.addf %346, %347 : vector<10x64xf32>
    %349 = arith.truncf %348 : vector<10x64xf32> to vector<10x64xbf16>
    %c1_140 = arith.constant 1 : index
    %c0_141 = arith.constant 0 : index
    %c0_142 = arith.constant 0 : index
    %350 = vector.load %arg8[%c1_140, %c0_141, %c0_142] : memref<2x64x128xbf16, #tpu.memory_space<vmem>>, vector<1x64x128xbf16>
    %351 = vector.shape_cast %350 : vector<1x64x128xbf16> to vector<64x128xbf16>
    %cst_143 = arith.constant dense<0.000000e+00> : vector<10x128xf32>
    %352 = tpu.matmul %349, %351, %cst_143 {dimension_numbers = #tpu.dot_dimension_numbers<[1], [0], [0], [1], [0, 0, 1, 1], [], []>} : vector<10x64xbf16>, vector<64x128xbf16>, vector<10x128xf32> -> vector<10x128xf32>
    %c1_144 = arith.constant 1 : index
    %c0_145 = arith.constant 0 : index
    %c0_146 = arith.constant 0 : index
    %353 = vector.load %arg9[%c1_144, %c0_145, %c0_146] : memref<2x1x128xf32, #tpu.memory_space<vmem>>, vector<1x1x128xf32>
    %354 = vector.shape_cast %353 : vector<1x1x128xf32> to vector<1x128xf32>
    %355 = vector.broadcast %354 : vector<1x128xf32> to vector<10x128xf32>
    %356 = arith.addf %352, %355 : vector<10x128xf32>
    %cst_147 = arith.constant 5.000000e-01 : f32
    %357 = vector.broadcast %cst_147 : f32 to vector<10x128xf32>
    %358 = arith.mulf %357, %356 : vector<10x128xf32>
    %cst_148 = arith.constant 4.471500e-02 : f32
    %359 = vector.broadcast %cst_148 : f32 to vector<10x128xf32>
    %360 = arith.mulf %359, %356 : vector<10x128xf32>
    %361 = arith.mulf %360, %356 : vector<10x128xf32>
    %362 = arith.mulf %361, %356 : vector<10x128xf32>
    %363 = arith.addf %356, %362 : vector<10x128xf32>
    %cst_149 = arith.constant 0.797884583 : f32
    %364 = vector.broadcast %cst_149 : f32 to vector<10x128xf32>
    %365 = arith.mulf %364, %363 : vector<10x128xf32>
    %366 = math.tanh %365 : vector<10x128xf32>
    %cst_150 = arith.constant 1.000000e+00 : f32
    %367 = vector.broadcast %cst_150 : f32 to vector<10x128xf32>
    %368 = arith.addf %367, %366 : vector<10x128xf32>
    %369 = arith.mulf %358, %368 : vector<10x128xf32>
    %370 = arith.truncf %369 : vector<10x128xf32> to vector<10x128xbf16>
    %c1_151 = arith.constant 1 : index
    %c0_152 = arith.constant 0 : index
    %c0_153 = arith.constant 0 : index
    %371 = vector.load %arg10[%c1_151, %c0_152, %c0_153] : memref<2x128x64xbf16, #tpu.memory_space<vmem>>, vector<1x128x64xbf16>
    %372 = vector.shape_cast %371 : vector<1x128x64xbf16> to vector<128x64xbf16>
    %cst_154 = arith.constant dense<0.000000e+00> : vector<10x64xf32>
    %373 = tpu.matmul %370, %372, %cst_154 {dimension_numbers = #tpu.dot_dimension_numbers<[1], [0], [0], [1], [0, 0, 1, 1], [], []>} : vector<10x128xbf16>, vector<128x64xbf16>, vector<10x64xf32> -> vector<10x64xf32>
    %c1_155 = arith.constant 1 : index
    %c0_156 = arith.constant 0 : index
    %c0_157 = arith.constant 0 : index
    %374 = vector.load %arg11[%c1_155, %c0_156, %c0_157] : memref<2x1x64xf32, #tpu.memory_space<vmem>>, vector<1x1x64xf32>
    %375 = vector.shape_cast %374 : vector<1x1x64xf32> to vector<1x64xf32>
    %376 = vector.broadcast %375 : vector<1x64xf32> to vector<10x64xf32>
    %377 = arith.addf %373, %376 : vector<10x64xf32>
    %378 = arith.addf %348, %377 : vector<10x64xf32>
    %c1_158 = arith.constant 1 : index
    %c0_159 = arith.constant 0 : index
    %c0_160 = arith.constant 0 : index
    %379 = vector.load %arg12[%c1_158, %c0_159, %c0_160] : memref<2x1x64xf32, #tpu.memory_space<vmem>>, vector<1x1x64xf32>
    %380 = vector.shape_cast %379 : vector<1x1x64xf32> to vector<1x64xf32>
    %c1_161 = arith.constant 1 : index
    %c0_162 = arith.constant 0 : index
    %c0_163 = arith.constant 0 : index
    %381 = vector.load %arg13[%c1_161, %c0_162, %c0_163] : memref<2x1x64xf32, #tpu.memory_space<vmem>>, vector<1x1x64xf32>
    %382 = vector.shape_cast %381 : vector<1x1x64xf32> to vector<1x64xf32>
    %cst_164 = arith.constant dense<0.000000e+00> : vector<10xf32>
    %383 = vector.multi_reduction <add>, %378, %cst_164 [1] : vector<10x64xf32> to vector<10xf32>
    %384 = vector.shape_cast %383 : vector<10xf32> to vector<10x1xf32>
    %cst_165 = arith.constant 6.400000e+01 : f32
    %385 = vector.broadcast %cst_165 : f32 to vector<10x1xf32>
    %386 = arith.divf %384, %385 : vector<10x1xf32>
    %387 = vector.broadcast %386 : vector<10x1xf32> to vector<10x64xf32>
    %388 = arith.subf %378, %387 : vector<10x64xf32>
    %389 = arith.mulf %388, %388 : vector<10x64xf32>
    %cst_166 = arith.constant dense<0.000000e+00> : vector<10xf32>
    %390 = vector.multi_reduction <add>, %389, %cst_166 [1] : vector<10x64xf32> to vector<10xf32>
    %391 = vector.shape_cast %390 : vector<10xf32> to vector<10x1xf32>
    %cst_167 = arith.constant 6.400000e+01 : f32
    %392 = vector.broadcast %cst_167 : f32 to vector<10x1xf32>
    %393 = arith.divf %391, %392 : vector<10x1xf32>
    %394 = vector.broadcast %386 : vector<10x1xf32> to vector<10x64xf32>
    %395 = arith.subf %378, %394 : vector<10x64xf32>
    %cst_168 = arith.constant 9.99999974E-6 : f32
    %396 = vector.broadcast %cst_168 : f32 to vector<10x1xf32>
    %397 = arith.addf %393, %396 : vector<10x1xf32>
    %398 = math.rsqrt %397 : vector<10x1xf32>
    %399 = vector.broadcast %398 : vector<10x1xf32> to vector<10x64xf32>
    %400 = arith.mulf %395, %399 : vector<10x64xf32>
    %401 = vector.broadcast %380 : vector<1x64xf32> to vector<10x64xf32>
    %402 = arith.mulf %400, %401 : vector<10x64xf32>
    %403 = vector.broadcast %382 : vector<1x64xf32> to vector<10x64xf32>
    %404 = arith.addf %402, %403 : vector<10x64xf32>
    %c0_169 = arith.constant 0 : index
    %c0_170 = arith.constant 0 : index
    %405 = vector.load %arg14[%c0_169, %c0_170] : memref<10x64xf32, #tpu.memory_space<vmem>>, vector<10x64xf32>
    tpu.vector_store %arg14[%c0_169, %c0_170], %404 {strides = array<i32>} : memref<10x64xf32, #tpu.memory_space<vmem>>, vector<10x64xf32>,
    return
  }
}

</mosaic_0001>

<bundles_post_ra>
// kernel: tpu_custom_call.1
= control target key start
LH: loop header
LB: loop body
LE: loop exit
PB: predicated region body
PF: predicated region fallthrough
CT: control target
= control target key end

     0   :  { %19 = vsyncpa [#allocation3], 0  ;;  %s3631_s0 = inlined_call_operand.vmem [shape: f32[10,64], index: 0, kind: input, shape index: {}]   ;;  %s3632_s1 = inlined_call_operand.vmem [shape: f32[4,10,10], index: 1, kind: input, shape index: {}]   ;;  %s3633_s2 = inlined_call_operand.vmem [shape: bf16[2,64,192], index: 2, kind: input, shape index: {}]   ;;  %s3634_s3 = inlined_call_operand.vmem [shape: f32[2,1,192], index: 3, kind: input, shape index: {}]   ;;  %s3635_s4 = inlined_call_operand.vmem [shape: bf16[2,64,64], index: 4, kind: input, shape index: {}]   ;;  %s3636_s5 = inlined_call_operand.vmem [shape: f32[2,1,64], index: 5, kind: input, shape index: {}]   ;;  %s3637_s6 = inlined_call_operand.vmem [shape: f32[2,1,64], index: 6, kind: input, shape index: {}]   ;;  %s3638_s7 = inlined_call_operand.vmem [shape: f32[2,1,64], index: 7, kind: input, shape index: {}]   ;;  %s3639_s8 = inlined_call_operand.hbm [shape: bf16[2,64,128], index: 8, kind: input, shape index: {}]   ;;  %s3640_s9 = inlined_call_operand.vmem [shape: f32[2,1,128], index: 9, kind: input, shape index: {}]   ;;  %s3641_s10 = inlined_call_operand.vmem [shape: bf16[2,128,64], index: 10, kind: input, shape index: {}]   ;;  %s3642_s11 = inlined_call_operand.vmem [shape: f32[2,1,64], index: 11, kind: input, shape index: {}]   ;;  %s3643_s12 = inlined_call_operand.vmem [shape: f32[2,1,64], index: 12, kind: input, shape index: {}]   ;;  %s3644_s13 = inlined_call_operand.vmem [shape: f32[2,1,64], index: 13, kind: input, shape index: {}]   ;;  %s3645_s14 = inlined_call_operand.hbm [shape: f32[10,64], index: 14, kind: output, shape index: {}]  }
   0x1   :  { %20 = vsyncpa [#allocation4], 0  ;;  %s2999_s29 = smov [#allocation2]  }
   0x2   :  { %s42_s30 = sshll.u32 %s2999_s29, 4  ;;  %s43_s30 = int_to_ptr.vmem [resolvable:$true] %s42_s30 }
   0x3   :  { %s2963_s15 = scalar_lea.vmem %s43_s30, 1024  ;;  %p2968_p1 = scmp.lt.s32.totalorder %s43_s30, %s43_s30 }
   0x4   :  { %p2964_p0 = scmp.ne.s32.totalorder %s43_s30, %s2963_s15  ;;  %p2969_p2 = scmp.lt.s32.totalorder %s2963_s15, %s2963_s15 }
   0x6   :  { %p2970_p3 = por %p2969_p2, %p2968_p1 }
   0x8   :  { %p2971_p4 = pnand %p2970_p3, %p2964_p0 }
   0xa   :  { %2974 = shalt.err (!%p2971_p4)
}
   0xb   :  { %s3000_s16 = smov 64   ;;  %s3001_s17 = smov 4  }
   0xc   :  { %48 = dma.hbm_to_vmem [thread:$0]  %s3639_s8, 1024, %s43_s30, [#allocation3], %s3000_s16, %s3000_s16, %s3001_s17  }
   0xd   :  { %2995 = dma.done.wait [#allocation3], 1024  }
   0xe   :  { %2996 = vsyncadd [#allocation3], 4294966272  ;;  %v3002_v0 = vmov 0   ;;  %v2811_v1 = vld [vmem:[%s3633_s2 + $0x34] ss:$8 sps:$4 sm:$0xff]   ;;  %vm126_vm0 = vcmask 523264   ;;  %v76_v13 = vlaneseq }
   0xf   :  { %162 = vmatprep.mubr.bf16.mxu0 %v3002_v0  ;;  %v2813_v2 = vld [vmem:[%s3633_s2 + $0x30] ss:$8 sps:$4 sm:$0xff]   ;;  %138 = vmatprep.subr.bf16.mxu0 %v2811_v1  ;;  %v2814_v3 = vld [vmem:[%s3633_s2 + $0x24] ss:$8 sps:$4 sm:$0xff]   ;;  %v2816_v4 = vld [vmem:[%s3633_s2 + $0x20] ss:$8 sps:$4 sm:$0xff]  }
  0x10   :  { %139 = vmatpush1.bf16.msra.mxu0 %v2813_v2  ;;  %v2817_v5 = vld [vmem:[%s3633_s2 + $0x14] ss:$8 sps:$4 sm:$0xff]   ;;  %v2819_v6 = vld [vmem:[%s3633_s2 + $0x10] ss:$8 sps:$4 sm:$0xff]   ;;  %v2820_v7 = vld [vmem:[%s3633_s2 + $0x4] ss:$8 sps:$4 sm:$0xff]  }
  0x11   :  { %140 = vmatprep.subr.bf16.mxu0 %v2814_v3  ;;  %v2822_v8 = vld [vmem:[%s3633_s2] ss:$8 sps:$4 sm:$0xff]   ;;  %v3003_v12 = vmov 0.0   ;;  %v3134_v14 = vshrl.u32 %v76_v13, 7  ;;  %vm3004_vm1 = vmmov 0   ;;  %vm264_vm2 = vcmask 1044480  }
  0x12   :  { %v3122_v9 = vld [vmem:[%s3631_s0] sm:$0xff]  ;;  %v3127_v10 = vld [vmem:[%s3631_s0 + $0x8] sm:$0x3]  ;;  %2594 = vmatprep.subr.bf16.mxu1 %v3003_v12  ;;  %2596 = vmatprep.mubr.msk.bf16.mxu1 %vm3004_vm1, %v3003_v12  ;;  %s3005_s25 = smov 112   ;;  %s3006_s8 = smov 48   ;;  %vm187_vm3 = vcmask 130048  }
  0x13   :  { %v65_v11 = vpack.c.bf16 %v3127_v10, %v3122_v9  ;;  %v78_v15 = vsub.s32 0, %v3134_v14  ;;  %v74_v16 = vld [vmem:[%s3634_s3] sm:$0x3]  ;;  %v82_v17 = vsub.s32 1, %v3134_v14  ;;  %vm235_vm4 = vcmask 80896   ;;  %v3189_v45 = vld [vmem:[%s3632_s1 + $0x10] sm:$0xff] }
  0x14   :  { %141 = vmatpush1.bf16.msra.mxu0 %v2816_v4  ;;  %v3176_v36 = vld [vmem:[%s3632_s1] sm:$0xff]  ;;  %v3182_v40 = vld [vmem:[%s3632_s1 + $0x8] sm:$0x3]  ;;  %vm239_vm5 = vcmask 74752   ;;  %v3196_v50 = vld [vmem:[%s3632_s1 + $0x18] sm:$0x3] }
  0x15   :  { %142 = vmatprep.subr.bf16.mxu0 %v2817_v5  ;;  %v79_v19 = vrot.slane %v74_v16, %v78_v15  ;;  %v83_v21 = vrot.slane %v74_v16, %v82_v17  ;;  %s3007_s19 = smov 32   ;;  %s3008_s20 = smov 96   ;;  %vm912_vm6 = vcmask 517120  }
  0x16   :  { %s3009_s29 = smov 80   ;;  %s3010_s30 = smov 16  }
  0x18   :  { %143 = vmatpush1.bf16.msra.mxu0 %v2819_v6 }
  0x19   :  { %144 = vmatprep.subr.bf16.mxu0 %v2820_v7 }
  0x1c   :  { %145 = vmatpush1.bf16.msra.mxu0 %v2822_v8 }
  0x1d   :  { %2588 = vmatprep.subr.bf16.mxu0 %v3003_v12 }
  0x1f   :  { %2384 = vmatmul.mubr.msk.bf16.vlgmr.msra.gmra.mxu0 %vm126_vm0, %v65_v11 }
  0x20   :  { %2590 = vmatprep.mubr.msk.bf16.mxu0 %vm3004_vm1, %v3003_v12 }
  0xdf   :  { %v164_v18 = vpop.f32.mrf.mxu0 }
  0xe0   :  { %v165_v23 = vadd.f32 %v164_v18, %v79_v19 }
  0xe1   :  { %v166_v20 = vpop.f32.mrf.mxu0 }
  0xe2   :  { %v167_v26 = vadd.f32 %v166_v20, %v83_v21 }
  0xe3   :  { %v168_v22 = vpop.f32.mrf.mxu0 }
  0xe4   :  { %v169_v24 = vadd.f32 %v168_v22, %v79_v19 }
  0xe5   :  { %v170_v25 = vpop.f32.mrf.mxu0 }
  0xe6   :  { %v3149_v27 = vpack.c.bf16 %v169_v24, %v165_v23  ;;  %v171_v28 = vadd.f32 %v170_v25, %v83_v21 }
  0xe8   :  { %v3151_v29 = vpack.c.bf16 %v171_v28, %v167_v26  ;;  %313 = vrot.lane.b32.xlu1 %v3149_v27, %s3005_s25  ;;  %185 = vrot.lane.b32.xlu0 %v3149_v27, %s3000_s16 }
  0xea   :  { %v266_v30 = vsel %vm264_vm2, %v3151_v29, 0 }
  0xeb   :  { %2595 = vmatpush3.bf16.msra.mxu1 %v266_v30 }
  0xec   :  { %315 = vrot.lane.b32.xlu0 %v3149_v27, %s3006_s8  ;;  %2606 = vmatprep.subr.bf16.mxu1 %v3003_v12 }
 0x15a   :  { %v186_v31 = vpop.permute.xlu0 %185  ;;  %v314_v35 = vpop.permute.xlu1 %313 }
 0x15b   :  { %v192_v32 = vsel %vm187_vm3, %v186_v31, 0 }
 0x15c   :  { %2589 = vmatpush3.bf16.xpose.msra.mxu0 %v192_v32 }
 0x15d   :  { %2600 = vmatprep.subr.bf16.mxu0 %v3003_v12 }
 0x15e   :  { %v316_v33 = vpop.permute.xlu0 %315 }
 0x15f   :  { %v321_v34 = vsel %vm187_vm3, %v316_v33, 0 }
 0x163   :  { %2591 = vmatmul.mubr.msk.bf16.vlgmr.msra.gmra.mxu0 %vm187_vm3, %v3149_v27 }
 0x164   :  { %2601 = vmatpush3.bf16.xpose.msra.mxu0 %v321_v34  ;;  %2602 = vmatprep.mubr.msk.bf16.mxu0 %vm3004_vm1, %v3003_v12 }
 0x165   :  { %2612 = vmatprep.subr.bf16.mxu0 %v3003_v12 }
 0x16b   :  { %2603 = vmatmul.mubr.msk.bf16.vlgmr.msra.gmra.mxu0 %vm187_vm3, %v314_v35 }
 0x16c   :  { %2614 = vmatprep.mubr.msk.bf16.mxu0 %vm3004_vm1, %v3003_v12 }
 0x223   :  { %v228_v37 = vpop.f32.mrf.mxu0 }
 0x224   :  { %v229_v38 = vadd.f32 %v228_v37, %v3176_v36 }
 0x225   :  { %v2592_v39 = vpop.f32.mrf.mxu0 }
 0x226   :  { %v236_v41 = vsel %vm235_vm4, %v229_v38, -inf  ;;  %v2824_v39 = vld [vmem:[%s3635_s4 + $0x8] sm:$0xff]  }
 0x227   :  { %237 = vmax.xlane.f32.xlu1 %v236_v41  ;;  %v231_v42 = vpop.f32.mrf.mxu0  ;;  %2613 = vmatpush3.bf16.msra.mxu0 %v2824_v39 }
 0x228   :  { %v232_v43 = vadd.f32 %v231_v42, %v3182_v40  ;;  %2624 = vmatprep.subr.bf16.mxu0 %v3003_v12 }
 0x229   :  { %v2593_v44 = vpop.f32.mrf.mxu0 }
 0x22a   :  { %v240_v46 = vsel %vm239_vm5, %v232_v43, -inf }
 0x22b   :  { %241 = vmax.xlane.f32.xlu0 %v240_v46  ;;  %v357_v47 = vpop.f32.mrf.mxu0 }
 0x22c   :  { %v358_v48 = vadd.f32 %v3189_v45, %v357_v47 }
 0x22d   :  { %v2604_v49 = vpop.f32.mrf.mxu0 }
 0x22e   :  { %v364_v51 = vsel %vm235_vm4, %v358_v48, -inf }
 0x22f   :  { %365 = vmax.xlane.f32.xlu0 %v364_v51  ;;  %v360_v52 = vpop.f32.mrf.mxu0 }
 0x230   :  { %v361_v53 = vadd.f32 %v3196_v50, %v360_v52 }
 0x231   :  { %v2605_v54 = vpop.f32.mrf.mxu0 }
 0x232   :  { %v367_v55 = vsel %vm239_vm5, %v361_v53, -inf }
 0x233   :  { %368 = vmax.xlane.f32.xlu1 %v367_v55 }
 0x2b0   :  { %v238_v56 = vpop.xlane.xlu1 %237 }
 0x2b1   :  { %v243_v57 = vsub.f32 %v229_v38, %v238_v56  ;;  %v2823_v38 = vld [vmem:[%s3635_s4] sm:$0xff]  }
 0x2b3   :  { %v245_v58 = vmul.f32 1.442695, %v243_v57 }
 0x2b4   :  { %v242_v59 = vpop.xlane.xlu0 %241 }
 0x2b5   :  { %2867 = vpow2.f32 %v245_v58  ;;  %v244_v60 = vsub.f32 %v232_v43, %v242_v59 }
 0x2b7   :  { %v247_v61 = vmul.f32 1.442695, %v244_v60 }
 0x2b8   :  { %v366_v62 = vpop.xlane.xlu0 %365 }
 0x2b9   :  { %2869 = vpow2.f32 %v247_v61  ;;  %v370_v63 = vsub.f32 %v358_v48, %v366_v62 }
 0x2bb   :  { %v372_v1 = vmul.f32 1.442695, %v370_v63 }
 0x2bc   :  { %v369_v2 = vpop.xlane.xlu1 %368 }
 0x2bd   :  { %2871 = vpow2.f32 %v372_v1  ;;  %v371_v3 = vsub.f32 %v361_v53, %v369_v2 }
 0x2bf   :  { %v374_v4 = vmul.f32 1.442695, %v371_v3  ;;  %v3245_v3 = vld [vmem:[%s3632_s1 + $0x20] sm:$0xff] }
 0x2c1   :  { %2873 = vpow2.f32 %v374_v4 }
 0x2c2   :  { %v2868_v5 = vpop.eup %2867 }
 0x2c3   :  { %v249_v6 = vsel %vm235_vm4, %v2868_v5, 0.0 }
 0x2c4   :  { %250 = vadd.xlane.f32.xlu0 %v249_v6 }
 0x2c6   :  { %v2870_v7 = vpop.eup %2869 }
 0x2c7   :  { %v252_v8 = vsel %vm239_vm5, %v2870_v7, 0.0 }
 0x2c8   :  { %253 = vadd.xlane.f32.xlu1 %v252_v8 }
 0x2ca   :  { %v2872_v11 = vpop.eup %2871 }
 0x2cb   :  { %v376_v13 = vsel %vm235_vm4, %v2872_v11, 0.0 }
 0x2cc   :  { %377 = vadd.xlane.f32.xlu0 %v376_v13 }
 0x2ce   :  { %v2874_v16 = vpop.eup %2873 }
 0x2cf   :  { %v379_v18 = vsel %vm239_vm5, %v2874_v16, 0.0 }
 0x2d0   :  { %380 = vadd.xlane.f32.xlu1 %v379_v18 }
 0x2e1   :  { %543 = vrot.lane.b32.xlu1 %v3149_v27, %s3007_s19 }
 0x2e2   :  { %388 = vrot.lane.b32.xlu0 %v3151_v29, %s3005_s25 }
 0x2e5   :  { %541 = vrot.lane.b32.xlu1 %v3149_v27, %s3008_s20 }
 0x34d   :  { %v251_v19 = vpop.xlane.xlu0 %250 }
 0x34e   :  { %2875 = vrcp.f32 %v251_v19 }
 0x351   :  { %v254_v20 = vpop.xlane.xlu1 %253 }
 0x352   :  { %2877 = vrcp.f32 %v254_v20 }
 0x355   :  { %v378_v21 = vpop.xlane.xlu0 %377 }
 0x356   :  { %2879 = vrcp.f32 %v378_v21 }
 0x359   :  { %v381_v22 = vpop.xlane.xlu1 %380  ;;  %v389_v28 = vpop.permute.xlu0 %388 }
 0x35a   :  { %2881 = vrcp.f32 %v381_v22  ;;  %v394_v31 = vsel %vm264_vm2, %v389_v28, 0 }
 0x35b   :  { %v2876_v23 = vpop.eup %2875 }
 0x35c   :  { %v257_v25 = vmul.f32 %v2876_v23, %v2868_v5 }
 0x35d   :  { %v544_v49 = vpop.permute.xlu1 %543 }
 0x35e   :  { %v549_v54 = vsel %vm187_vm3, %v544_v49, 0 }
 0x35f   :  { %v2878_v24 = vpop.eup %2877 }
 0x360   :  { %v258_v26 = vmul.f32 %v2878_v24, %v2870_v7  ;;  %v3251_v7 = vld [vmem:[%s3632_s1 + $0x28] sm:$0x3] }
 0x361   :  { %v542_v55 = vpop.permute.xlu1 %541 }
 0x362   :  { %v259_v30 = vpack.c.bf16 %v258_v26, %v257_v25 }
 0x363   :  { %v2880_v32 = vpop.eup %2879 }
 0x364   :  { %2597 = vmatmul.mubr.msk.bf16.vlgmr.msra.gmra.mxu1 %vm235_vm4, %v259_v30  ;;  %v384_v34 = vmul.f32 %v2880_v32, %v2872_v11 }
 0x365   :  { %2607 = vmatpush3.bf16.msra.mxu1 %v394_v31  ;;  %2608 = vmatprep.mubr.msk.bf16.mxu1 %vm3004_vm1, %v3003_v12 }
 0x366   :  { %2618 = vmatprep.subr.bf16.mxu1 %v3003_v12 }
 0x367   :  { %v2882_v33 = vpop.eup %2881 }
 0x368   :  { %v385_v35 = vmul.f32 %v2882_v33, %v2874_v16 }
 0x36a   :  { %v386_v37 = vpack.c.bf16 %v385_v35, %v384_v34 }
 0x36c   :  { %2609 = vmatmul.mubr.msk.bf16.vlgmr.msra.gmra.mxu1 %vm235_vm4, %v386_v37 }
 0x36d   :  { %2620 = vmatprep.mubr.msk.bf16.mxu1 %vm3004_vm1, %v3003_v12  ;;  %2619 = vmatpush3.bf16.msra.mxu1 %v2823_v38 }
 0x36e   :  { %2630 = vmatprep.subr.bf16.mxu1 %v3003_v12 }
 0x424   :  { %v302_v41 = vpop.f32.mrf.mxu1 }
 0x426   :  { %v2598_v42 = vpop.f32.mrf.mxu1 }
 0x428   :  { %v305_v43 = vpop.f32.mrf.mxu1 }
 0x429   :  { %v309_v44 = vpack.c.bf16 %v305_v43, %v302_v41 }
 0x42a   :  { %v2599_v46 = vpop.f32.mrf.mxu1 }
 0x42b   :  { %2621 = vmatmul.mubr.msk.bf16.vlgmr.msra.gmra.mxu1 %vm187_vm3, %v309_v44  ;;  %v2825_v44 = vld [vmem:[%s3635_s4 + $0x10] sm:$0xff]  }
 0x42c   :  { %v430_v47 = vpop.f32.mrf.mxu1  ;;  %2632 = vmatprep.mubr.msk.bf16.mxu1 %vm3004_vm1, %v3003_v12 }
 0x42e   :  { %v2610_v48 = vpop.f32.mrf.mxu1 }
 0x430   :  { %v433_v51 = vpop.f32.mrf.mxu1 }
 0x431   :  { %v437_v52 = vpack.c.bf16 %v433_v51, %v430_v47 }
 0x432   :  { %v2611_v53 = vpop.f32.mrf.mxu1 }
 0x433   :  { %2615 = vmatmul.mubr.msk.bf16.vlgmr.msra.gmra.mxu0 %vm187_vm3, %v437_v52  ;;  %v3281_v52 = vld [vmem:[%s3632_s1 + $0x30] sm:$0xff] }
 0x434   :  { %2625 = vmatpush3.bf16.xpose.msra.mxu0 %v549_v54  ;;  %2626 = vmatprep.mubr.msk.bf16.mxu0 %vm3004_vm1, %v3003_v12 }
 0x435   :  { %2636 = vmatprep.subr.bf16.mxu0 %v3003_v12 }
 0x43b   :  { %2627 = vmatmul.mubr.msk.bf16.vlgmr.msra.gmra.mxu0 %vm187_vm3, %v542_v55 }
 0x43c   :  { %2638 = vmatprep.mubr.msk.bf16.mxu0 %vm3004_vm1, %v3003_v12  ;;  %2637 = vmatpush3.bf16.msra.mxu0 %v2825_v44 }
 0x43d   :  { %2648 = vmatprep.subr.bf16.mxu0 %v3003_v12 }
 0x4eb   :  { %v531_v56 = vpop.f32.mrf.mxu1 }
 0x4ed   :  { %v2622_v57 = vpop.f32.mrf.mxu1 }
 0x4ef   :  { %v534_v58 = vpop.f32.mrf.mxu1 }
 0x4f1   :  { %v2623_v59 = vpop.f32.mrf.mxu1 }
 0x4f3   :  { %v481_v60 = vpop.f32.mrf.mxu0 }
 0x4f4   :  { %v3238_v61 = vadd.f32 %v531_v56, %v481_v60  ;;  %v3290_v56 = vld [vmem:[%s3632_s1 + $0x38] sm:$0x3] }
 0x4f5   :  { %v2616_v62 = vpop.f32.mrf.mxu0 }
 0x4f7   :  { %v484_v63 = vpop.f32.mrf.mxu0 }
 0x4f8   :  { %v3240_v1 = vadd.f32 %v534_v58, %v484_v63 }
 0x4f9   :  { %v2617_v2 = vpop.f32.mrf.mxu0 }
 0x4fb   :  { %v585_v4 = vpop.f32.mrf.mxu0 }
 0x4fc   :  { %v586_v5 = vadd.f32 %v3245_v3, %v585_v4 }
 0x4fd   :  { %v2628_v6 = vpop.f32.mrf.mxu0 }
 0x4fe   :  { %v592_v8 = vsel %vm235_vm4, %v586_v5, -inf }
 0x4ff   :  { %593 = vmax.xlane.f32.xlu0 %v592_v8  ;;  %v588_v11 = vpop.f32.mrf.mxu0 }
 0x500   :  { %v589_v13 = vadd.f32 %v3251_v7, %v588_v11 }
 0x501   :  { %v2629_v16 = vpop.f32.mrf.mxu0 }
 0x502   :  { %v595_v18 = vsel %vm239_vm5, %v589_v13, -inf }
 0x503   :  { %596 = vmax.xlane.f32.xlu1 %v595_v18 }
 0x514   :  { %615 = vrot.lane.b32.xlu1 %v3151_v29, %s3008_s20 }
 0x518   :  { %720 = vrot.lane.b32.xlu1 %v3149_v27, %s3009_s29 }
 0x588   :  { %v594_v19 = vpop.xlane.xlu0 %593 }
 0x589   :  { %v598_v20 = vsub.f32 %v586_v5, %v594_v19 }
 0x58b   :  { %v600_v21 = vmul.f32 1.442695, %v598_v20 }
 0x58c   :  { %v597_v22 = vpop.xlane.xlu1 %596 }
 0x58d   :  { %2883 = vpow2.f32 %v600_v21  ;;  %v599_v23 = vsub.f32 %v589_v13, %v597_v22 }
 0x58f   :  { %v602_v24 = vmul.f32 1.442695, %v599_v23 }
 0x590   :  { %v616_v25 = vpop.permute.xlu1 %615 }
 0x591   :  { %2885 = vpow2.f32 %v602_v24  ;;  %v621_v26 = vsel %vm264_vm2, %v616_v25, 0 }
 0x592   :  { %2631 = vmatpush3.bf16.msra.mxu1 %v621_v26 }
 0x593   :  { %2642 = vmatprep.subr.bf16.mxu1 %v3003_v12 }
 0x59a   :  { %v2884_v28 = vpop.eup %2883 }
 0x59b   :  { %v604_v30 = vsel %vm235_vm4, %v2884_v28, 0.0 }
 0x59c   :  { %605 = vadd.xlane.f32.xlu0 %v604_v30 }
 0x59e   :  { %v2886_v31 = vpop.eup %2885 }
 0x59f   :  { %v607_v32 = vsel %vm239_vm5, %v2886_v31, 0.0 }
 0x5a0   :  { %608 = vadd.xlane.f32.xlu0 %v607_v32 }
 0x5b6   :  { %722 = vrot.lane.b32.xlu0 %v3149_v27, %s3010_s30  ;;  %v721_v27 = vpop.permute.xlu1 %720 }
 0x625   :  { %v606_v33 = vpop.xlane.xlu0 %605 }
 0x626   :  { %2887 = vrcp.f32 %v606_v33 }
 0x629   :  { %v609_v34 = vpop.xlane.xlu0 %608 }
 0x62a   :  { %2889 = vrcp.f32 %v609_v34 }
 0x62d   :  { %v723_v41 = vpop.permute.xlu0 %722 }
 0x62e   :  { %v728_v43 = vsel %vm187_vm3, %v723_v41, 0 }
 0x633   :  { %v2888_v35 = vpop.eup %2887 }
 0x634   :  { %v612_v38 = vmul.f32 %v2888_v35, %v2884_v28 }
 0x637   :  { %v2890_v37 = vpop.eup %2889 }
 0x638   :  { %v613_v39 = vmul.f32 %v2890_v37, %v2886_v31 }
 0x63a   :  { %v614_v42 = vpack.c.bf16 %v613_v39, %v612_v38 }
 0x63c   :  { %2633 = vmatmul.mubr.msk.bf16.vlgmr.msra.gmra.mxu1 %vm235_vm4, %v614_v42  ;;  %v2407_v42 = vld [vmem:[%s3636_s5] ss:$0 sm:$0xff] }
 0x63d   :  { %2643 = vmatpush3.bf16.xpose.msra.mxu1 %v728_v43  ;;  %2644 = vmatprep.mubr.msk.bf16.mxu1 %vm3004_vm1, %v3003_v12 }
 0x63e   :  { %2654 = vmatprep.subr.bf16.mxu1 %v3003_v12 }
 0x644   :  { %2645 = vmatmul.mubr.msk.bf16.vlgmr.msra.gmra.mxu1 %vm187_vm3, %v721_v27 }
 0x645   :  { %2656 = vmatprep.mubr.msk.bf16.mxu1 %vm3004_vm1, %v3003_v12 }
 0x6fc   :  { %v657_v46 = vpop.f32.mrf.mxu1 }
 0x6fe   :  { %v2634_v47 = vpop.f32.mrf.mxu1 }
 0x700   :  { %v660_v48 = vpop.f32.mrf.mxu1 }
 0x701   :  { %v664_v49 = vpack.c.bf16 %v660_v48, %v657_v46 }
 0x702   :  { %v2635_v51 = vpop.f32.mrf.mxu1 }
 0x703   :  { %2639 = vmatmul.mubr.msk.bf16.vlgmr.msra.gmra.mxu0 %vm187_vm3, %v664_v49 }
 0x704   :  { %v764_v53 = vpop.f32.mrf.mxu1  ;;  %2650 = vmatprep.mubr.msk.bf16.mxu0 %vm3004_vm1, %v3003_v12 }
 0x705   :  { %v765_v54 = vadd.f32 %v3281_v52, %v764_v53 }
 0x706   :  { %v2646_v55 = vpop.f32.mrf.mxu1 }
 0x707   :  { %v771_v57 = vsel %vm235_vm4, %v765_v54, -inf }
 0x708   :  { %772 = vmax.xlane.f32.xlu1 %v771_v57  ;;  %v767_v58 = vpop.f32.mrf.mxu1 }
 0x709   :  { %v768_v59 = vadd.f32 %v3290_v56, %v767_v58 }
 0x70a   :  { %v2647_v60 = vpop.f32.mrf.mxu1 }
 0x70b   :  { %v774_v62 = vsel %vm239_vm5, %v768_v59, -inf }
 0x70c   :  { %775 = vmax.xlane.f32.xlu0 %v774_v62 }
 0x791   :  { %v773_v63 = vpop.xlane.xlu1 %772 }
 0x792   :  { %v777_v2 = vsub.f32 %v765_v54, %v773_v63 }
 0x794   :  { %v779_v4 = vmul.f32 1.442695, %v777_v2 }
 0x795   :  { %v776_v5 = vpop.xlane.xlu0 %775 }
 0x796   :  { %2891 = vpow2.f32 %v779_v4  ;;  %v778_v6 = vsub.f32 %v768_v59, %v776_v5 }
 0x798   :  { %v781_v8 = vmul.f32 1.442695, %v778_v6  ;;  %v2827_v6 = vld [vmem:[#allocation2 + $0x18] sm:$0xff]  }
 0x79a   :  { %2893 = vpow2.f32 %v781_v8  ;;  %v2829_v8 = vld [vmem:[#allocation2 + $0x8] sm:$0xff]  }
 0x7a3   :  { %v2892_v11 = vpop.eup %2891 }
 0x7a4   :  { %v783_v13 = vsel %vm235_vm4, %v2892_v11, 0.0 }
 0x7a5   :  { %784 = vadd.xlane.f32.xlu0 %v783_v13 }
 0x7a7   :  { %v2894_v16 = vpop.eup %2893 }
 0x7a8   :  { %v786_v18 = vsel %vm239_vm5, %v2894_v16, 0.0 }
 0x7a9   :  { %787 = vadd.xlane.f32.xlu1 %v786_v18 }
 0x7bb   :  { %794 = vrot.lane.b32.xlu0 %v3151_v29, %s3009_s29 }
 0x7c3   :  { %v708_v19 = vpop.f32.mrf.mxu0 }
 0x7c4   :  { %v715_v20 = vadd.f32 %v708_v19, %v3238_v61 }
 0x7c5   :  { %v2640_v21 = vpop.f32.mrf.mxu0 }
 0x7c7   :  { %v711_v22 = vpop.f32.mrf.mxu0 }
 0x7c8   :  { %v716_v23 = vadd.f32 %v711_v22, %v3240_v1  ;;  %v2826_v1 = vld [vmem:[%s3635_s4 + $0x18] sm:$0xff]  }
 0x7c9   :  { %v2641_v24 = vpop.f32.mrf.mxu0  ;;  %2655 = vmatpush3.bf16.msra.mxu1 %v2826_v1  ;;  %v2832_v1 = vld [vmem:[%s3641_s10 + $0x30] sm:$0xff]  }
 0x7ca   :  { %2672 = vmatprep.subr.bf16.mxu1 %v3003_v12  ;;  %v2408_v24 = vld [vmem:[%s3637_s6] ss:$0 sm:$0xff] }
 0x82e   :  { %v785_v25 = vpop.xlane.xlu0 %784 }
 0x82f   :  { %2895 = vrcp.f32 %v785_v25 }
 0x832   :  { %v788_v26 = vpop.xlane.xlu1 %787  ;;  %v795_v28 = vpop.permute.xlu0 %794 }
 0x833   :  { %2897 = vrcp.f32 %v788_v26  ;;  %v800_v30 = vsel %vm264_vm2, %v795_v28, 0 }
 0x834   :  { %2649 = vmatpush3.bf16.msra.mxu0 %v800_v30  ;;  %v2409_v30 = vld [vmem:[%s3638_s7] ss:$0 sm:$0xff] }
 0x835   :  { %2660 = vmatprep.subr.bf16.mxu0 %v3003_v12 }
 0x83c   :  { %v2896_v31 = vpop.eup %2895 }
 0x83d   :  { %v791_v32 = vmul.f32 %v2896_v31, %v2892_v11  ;;  %v2830_v11 = vld [vmem:[#allocation2] sm:$0xff]  }
 0x840   :  { %v2898_v29 = vpop.eup %2897 }
 0x841   :  { %v792_v33 = vmul.f32 %v2898_v29, %v2894_v16 }
 0x843   :  { %v793_v61 = vpack.c.bf16 %v792_v33, %v791_v32 }
 0x845   :  { %2651 = vmatmul.mubr.msk.bf16.vlgmr.msra.gmra.mxu0 %vm235_vm4, %v793_v61  ;;  %v2831_v61 = vld [vmem:[%s3641_s10 + $0x38] sm:$0xff]  }
 0x846   :  { %2668 = vmatprep.mubr.msk.bf16.mxu0 %vm3004_vm1, %v3003_v12  ;;  %2661 = vmatpush3.bf16.msra.mxu0 %v2827_v6 }
 0x847   :  { %2662 = vmatprep.subr.bf16.mxu0 %v3003_v12 }
 0x905   :  { %v836_v34 = vpop.f32.mrf.mxu0 }
 0x907   :  { %v2652_v35 = vpop.f32.mrf.mxu0 }
 0x908   :  { %v2835_v35 = vld [vmem:[%s3641_s10 + $0x18] sm:$0xff]  }
 0x909   :  { %v839_v37 = vpop.f32.mrf.mxu0 }
 0x90a   :  { %v843_v38 = vpack.c.bf16 %v839_v37, %v836_v34  ;;  %v2833_v34 = vld [vmem:[%s3641_s10 + $0x28] sm:$0xff]   ;;  %v2836_v37 = vld [vmem:[%s3641_s10 + $0x10] sm:$0xff]  }
 0x90b   :  { %v2653_v39 = vpop.f32.mrf.mxu0 }
 0x90c   :  { %2657 = vmatmul.mubr.msk.bf16.vlgmr.msra.gmra.mxu1 %vm187_vm3, %v843_v38  ;;  %v2837_v38 = vld [vmem:[%s3641_s10 + $0x8] sm:$0xff]   ;;  %v2838_v39 = vld [vmem:[%s3641_s10] sm:$0xff]  }
 0x90d   :  { %2688 = vmatprep.mubr.msk.bf16.mxu1 %vm3004_vm1, %v3003_v12  ;;  %2673 = vmatpush3.bf16.msra.mxu1 %v2831_v61 }
 0x90e   :  { %2674 = vmatprep.subr.bf16.mxu1 %v3003_v12 }
 0x911   :  { %2675 = vmatpush3.bf16.msra.mxu1 %v2832_v1 }
 0x912   :  { %2676 = vmatprep.subr.bf16.mxu1 %v3003_v12 }
 0x915   :  { %2677 = vmatpush3.bf16.msra.mxu1 %v2833_v34 }
 0x916   :  { %2678 = vmatprep.subr.bf16.mxu1 %v3003_v12 }
 0x9cc   :  { %v887_v41 = vpop.f32.mrf.mxu1 }
 0x9cd   :  { %v894_v43 = vadd.f32 %v887_v41, %v715_v20  ;;  %v2410_v41 = vld [vmem:[%s3640_s9] ss:$0 sm:$0xff] }
 0x9ce   :  { %v2658_v27 = vpop.f32.mrf.mxu1 }
 0x9cf   :  { %v903_v44 = vadd.f32 %v2407_v42, %v894_v43 }
 0x9d0   :  { %v890_v46 = vpop.f32.mrf.mxu1 }
 0x9d1   :  { %v895_v47 = vadd.f32 %v890_v46, %v716_v23  ;;  %v905_v48 = vadd.f32 %v903_v44, %v3122_v9 }
 0x9d2   :  { %v2659_v49 = vpop.f32.mrf.mxu1 }
 0x9d3   :  { %v904_v51 = vadd.f32 %v2407_v42, %v895_v47  ;;  %v909_v53 = vsel %vm126_vm0, %v905_v48, 0.0 }
 0x9d4   :  { %910 = vadd.xlane.f32.xlu1 %v909_v53 }
 0x9d5   :  { %v906_v54 = vadd.f32 %v904_v51, %v3127_v10  ;;  %v2828_v10 = vld [vmem:[#allocation2 + $0x10] sm:$0xff]  }
 0x9d6   :  { %2663 = vmatpush3.bf16.msra.mxu0 %v2828_v10 }
 0x9d7   :  { %v913_v55 = vsel %vm912_vm6, %v906_v54, 0.0  ;;  %2664 = vmatprep.subr.bf16.mxu0 %v3003_v12 }
 0x9d8   :  { %914 = vadd.xlane.f32.xlu1 %v913_v55 }
 0x9da   :  { %2665 = vmatpush3.bf16.msra.mxu0 %v2829_v8 }
 0x9db   :  { %2666 = vmatprep.subr.bf16.mxu0 %v3003_v12 }
 0x9de   :  { %2667 = vmatpush3.bf16.msra.mxu0 %v2830_v11  ;;  %v2416_v11 = vld [vmem:[%s3642_s11] ss:$0 sm:$0xff] }
 0xa5d   :  { %v911_v57 = vpop.xlane.xlu1 %910 }
 0xa5e   :  { %v917_v58 = vmul.f32 0.015625, %v911_v57 }
 0xa60   :  { %v919_v59 = vsub.f32 %v905_v48, %v917_v58 }
 0xa61   :  { %v915_v60 = vpop.xlane.xlu1 %914 }
 0xa62   :  { %v918_v62 = vmul.f32 0.015625, %v915_v60  ;;  %v921_v63 = vmul.f32 %v919_v59, %v919_v59 }
 0xa64   :  { %v920_v2 = vsub.f32 %v906_v54, %v918_v62  ;;  %v923_v9 = vsel %vm126_vm0, %v921_v63, 0.0 }
 0xa65   :  { %924 = vadd.xlane.f32.xlu1 %v923_v9 }
 0xa66   :  { %v922_v4 = vmul.f32 %v920_v2, %v920_v2 }
 0xa68   :  { %v926_v5 = vsel %vm912_vm6, %v922_v4, 0.0 }
 0xa69   :  { %927 = vadd.xlane.f32.xlu1 %v926_v5 }
 0xaee   :  { %v925_v13 = vpop.xlane.xlu1 %924 }
 0xaef   :  { %v929_v16 = vmul.f32 0.015625, %v925_v13 }
 0xaf1   :  { %v931_v18 = vadd.f32 1e-05, %v929_v16 }
 0xaf2   :  { %v928_v19 = vpop.xlane.xlu1 %927 }
 0xaf3   :  { %2899 = vrsqrt.f32 %v931_v18  ;;  %v930_v20 = vmul.f32 0.015625, %v928_v19 }
 0xaf5   :  { %v932_v21 = vadd.f32 1e-05, %v930_v20 }
 0xaf7   :  { %2901 = vrsqrt.f32 %v932_v21 }
 0xb00   :  { %v2900_v22 = vpop.eup %2899 }
 0xb01   :  { %v935_v23 = vmul.f32 %v2900_v22, %v919_v59 }
 0xb03   :  { %v943_v28 = vmul.f32 %v2408_v24, %v935_v23 }
 0xb04   :  { %v2902_v25 = vpop.eup %2901 }
 0xb05   :  { %v936_v26 = vmul.f32 %v2902_v25, %v920_v2  ;;  %v3331_v29 = vadd.f32 %v2409_v30, %v943_v28 }
 0xb07   :  { %v944_v31 = vmul.f32 %v2408_v24, %v936_v26 }
 0xb09   :  { %v3333_v32 = vadd.f32 %v2409_v30, %v944_v31 }
 0xb0b   :  { %v953_v33 = vpack.c.bf16 %v3333_v32, %v3331_v29 }
 0xb0d   :  { %2669 = vmatmul.mubr.msk.bf16.vlgmr.msra.gmra.mxu0 %vm126_vm0, %v953_v33 }
 0xb0e   :  { %1312 = vmatprep.mubr.bf16.mxu0 %v3002_v0  ;;  %v2834_v0 = vld [vmem:[%s3641_s10 + $0x20] sm:$0xff]  }
 0xb0f   :  { %2679 = vmatpush3.bf16.msra.mxu1 %v2834_v0 }
 0xb10   :  { %2680 = vmatprep.subr.bf16.mxu1 %v3003_v12 }
 0xb13   :  { %2681 = vmatpush3.bf16.msra.mxu1 %v2835_v35  ;;  %v2839_v35 = vld [vmem:[%s3633_s2 + $0x70] ss:$8 sps:$4 sm:$0xff]  }
 0xb14   :  { %2682 = vmatprep.subr.bf16.mxu1 %v3003_v12 }
 0xb17   :  { %2683 = vmatpush3.bf16.msra.mxu1 %v2836_v37  ;;  %v2844_v37 = vld [vmem:[%s3633_s2 + $0x64] ss:$8 sps:$4 sm:$0xff]  }
 0xb18   :  { %2684 = vmatprep.subr.bf16.mxu1 %v3003_v12 }
 0xb1b   :  { %2685 = vmatpush3.bf16.msra.mxu1 %v2837_v38  ;;  %v2842_v38 = vld [vmem:[%s3633_s2 + $0x60] ss:$8 sps:$4 sm:$0xff]  }
 0xb1c   :  { %2686 = vmatprep.subr.bf16.mxu1 %v3003_v12 }
 0xb1f   :  { %2687 = vmatpush3.bf16.msra.mxu1 %v2838_v39  ;;  %v2847_v39 = vld [vmem:[%s3633_s2 + $0x54] ss:$8 sps:$4 sm:$0xff]  }
 0xb20   :  { %2698 = vmatprep.subr.bf16.mxu1 %v3003_v12 }
 0xbcd   :  { %v1030_v42 = vpop.f32.mrf.mxu0 }
 0xbce   :  { %v1031_v43 = vadd.f32 %v2410_v41, %v1030_v42  ;;  %v2850_v42 = vld [vmem:[%s3633_s2 + $0x44] ss:$8 sps:$4 sm:$0xff]  }
 0xbcf   :  { %v2670_v27 = vpop.f32.mrf.mxu0 }
 0xbd0   :  { %v1039_v44 = vmul.f32 0.044715, %v1031_v43  ;;  %v1037_v9 = vmul.f32 0.5, %v1031_v43 }
 0xbd1   :  { %v1033_v46 = vpop.f32.mrf.mxu0 }
 0xbd2   :  { %v1041_v47 = vmul.f32 %v1039_v44, %v1031_v43  ;;  %v1034_v48 = vadd.f32 %v2410_v41, %v1033_v46  ;;  %v2845_v41 = vld [vmem:[%s3633_s2 + $0x50] ss:$8 sps:$4 sm:$0xff]  }
 0xbd3   :  { %v2671_v49 = vpop.f32.mrf.mxu0 }
 0xbd4   :  { %v1043_v51 = vmul.f32 %v1041_v47, %v1031_v43  ;;  %v1040_v53 = vmul.f32 0.044715, %v1034_v48  ;;  %v1038_v4 = vmul.f32 0.5, %v1034_v48 }
 0xbd6   :  { %v1045_v54 = vadd.f32 %v1043_v51, %v1031_v43  ;;  %v1042_v55 = vmul.f32 %v1040_v53, %v1034_v48  ;;  %v2848_v43 = vld [vmem:[%s3633_s2 + $0x40] ss:$8 sps:$4 sm:$0xff]  }
 0xbd8   :  { %v1047_v57 = vmul.f32 0.7978846, %v1045_v54  ;;  %v1044_v58 = vmul.f32 %v1042_v55, %v1034_v48  ;;  %v2425_v54 = vld [vmem:[%s3643_s12] ss:$0 sm:$0xff] }
 0xbda   :  { %2903 = vtanh.f32 %v1047_v57  ;;  %v1046_v59 = vadd.f32 %v1044_v58, %v1034_v48 }
 0xbdc   :  { %v1048_v60 = vmul.f32 0.7978846, %v1046_v59  ;;  %v2426_v59 = vld [vmem:[%s3644_s13] ss:$0 sm:$0xff] }
 0xbde   :  { %2905 = vtanh.f32 %v1048_v60 }
 0xbe7   :  { %v2904_v62 = vpop.eup %2903 }
 0xbe8   :  { %v1051_v63 = vadd.f32 1.0, %v2904_v62 }
 0xbea   :  { %v1053_v6 = vmul.f32 %v1051_v63, %v1037_v9  ;;  %v2435_v9 = vld [vmem:[%s3634_s3 + $0x2] sm:$0x3] }
 0xbeb   :  { %v2906_v2 = vpop.eup %2905 }
 0xbec   :  { %v1052_v5 = vadd.f32 1.0, %v2906_v2 }
 0xbee   :  { %v1054_v10 = vmul.f32 %v1052_v5, %v1038_v4  ;;  %v1230_v5 = vrot.slane %v2435_v9, %v78_v15 }
 0xbf0   :  { %v1055_v8 = vpack.c.bf16 %v1054_v10, %v1053_v6  ;;  %v1234_v10 = vrot.slane %v2435_v9, %v82_v17 }
 0xbf2   :  { %2689 = vmatmul.mubr.bf16.vlgmr.msra.gmra.mxu1 %v1055_v8 }
 0xbf3   :  { %2700 = vmatprep.mubr.msk.bf16.mxu1 %vm3004_vm1, %v3003_v12 }
 0xcb2   :  { %v1161_v13 = vpop.f32.mrf.mxu1 }
 0xcb3   :  { %v1162_v16 = vadd.f32 %v2416_v11, %v1161_v13 }
 0xcb4   :  { %v2690_v18 = vpop.f32.mrf.mxu1 }
 0xcb5   :  { %v1168_v19 = vadd.f32 %v1162_v16, %v3331_v29 }
 0xcb6   :  { %v1164_v20 = vpop.f32.mrf.mxu1 }
 0xcb7   :  { %v1165_v21 = vadd.f32 %v2416_v11, %v1164_v20  ;;  %v1172_v22 = vsel %vm126_vm0, %v1168_v19, 0.0 }
 0xcb8   :  { %1173 = vadd.xlane.f32.xlu1 %v1172_v22  ;;  %v2691_v23 = vpop.f32.mrf.mxu1 }
 0xcb9   :  { %v1169_v24 = vadd.f32 %v1165_v21, %v3333_v32  ;;  %v2841_v32 = vld [vmem:[%s3633_s2 + $0x74] ss:$8 sps:$4 sm:$0xff]  }
 0xcba   :  { %1288 = vmatprep.subr.bf16.mxu0 %v2841_v32 }
 0xcbb   :  { %v1175_v25 = vsel %vm912_vm6, %v1169_v24, 0.0  ;;  %1289 = vmatpush1.bf16.msra.mxu0 %v2839_v35 }
 0xcbc   :  { %1176 = vadd.xlane.f32.xlu1 %v1175_v25  ;;  %1290 = vmatprep.subr.bf16.mxu0 %v2844_v37 }
 0xcbf   :  { %1291 = vmatpush1.bf16.msra.mxu0 %v2842_v38 }
 0xcc0   :  { %1292 = vmatprep.subr.bf16.mxu0 %v2847_v39 }
 0xcc3   :  { %1293 = vmatpush1.bf16.msra.mxu0 %v2845_v41 }
 0xcc4   :  { %1294 = vmatprep.subr.bf16.mxu0 %v2850_v42 }
 0xcc7   :  { %1295 = vmatpush1.bf16.msra.mxu0 %v2848_v43 }
 0xcc8   :  { %2692 = vmatprep.subr.bf16.mxu0 %v3003_v12 }
 0xd41   :  { %v1174_v26 = vpop.xlane.xlu1 %1173 }
 0xd42   :  { %v1178_v28 = vmul.f32 0.015625, %v1174_v26 }
 0xd44   :  { %v1180_v30 = vsub.f32 %v1168_v19, %v1178_v28 }
 0xd45   :  { %v1177_v31 = vpop.xlane.xlu1 %1176 }
 0xd46   :  { %v1179_v33 = vmul.f32 0.015625, %v1177_v31  ;;  %v1182_v61 = vmul.f32 %v1180_v30, %v1180_v30 }
 0xd48   :  { %v1181_v1 = vsub.f32 %v1169_v24, %v1179_v33  ;;  %v1184_v29 = vsel %vm126_vm0, %v1182_v61, 0.0 }
 0xd49   :  { %1185 = vadd.xlane.f32.xlu0 %v1184_v29 }
 0xd4a   :  { %v1183_v34 = vmul.f32 %v1181_v1, %v1181_v1 }
 0xd4c   :  { %v1187_v0 = vsel %vm912_vm6, %v1183_v34, 0.0 }
 0xd4d   :  { %1188 = vadd.xlane.f32.xlu1 %v1187_v0 }
 0xdd2   :  { %v1186_v27 = vpop.xlane.xlu0 %1185 }
 0xdd3   :  { %v1190_v44 = vmul.f32 0.015625, %v1186_v27 }
 0xdd5   :  { %v1192_v46 = vadd.f32 1e-05, %v1190_v44 }
 0xdd6   :  { %v1189_v47 = vpop.xlane.xlu1 %1188 }
 0xdd7   :  { %2907 = vrsqrt.f32 %v1192_v46  ;;  %v1191_v48 = vmul.f32 0.015625, %v1189_v47 }
 0xdd9   :  { %v1193_v49 = vadd.f32 1e-05, %v1191_v48 }
 0xddb   :  { %2909 = vrsqrt.f32 %v1193_v49 }
 0xde4   :  { %v2908_v51 = vpop.eup %2907 }
 0xde5   :  { %v1196_v53 = vmul.f32 %v2908_v51, %v1180_v30 }
 0xde7   :  { %v1204_v58 = vmul.f32 %v2425_v54, %v1196_v53 }
 0xde8   :  { %v2910_v55 = vpop.eup %2909 }
 0xde9   :  { %v1197_v57 = vmul.f32 %v2910_v55, %v1181_v1  ;;  %v3416_v62 = vadd.f32 %v2426_v59, %v1204_v58 }
 0xdeb   :  { %v1205_v60 = vmul.f32 %v2425_v54, %v1197_v57 }
 0xded   :  { %v3418_v63 = vadd.f32 %v2426_v59, %v1205_v60 }
 0xdef   :  { %v1214_v2 = vpack.c.bf16 %v3418_v63, %v3416_v62 }
 0xdf1   :  { %2444 = vmatmul.mubr.msk.bf16.vlgmr.msra.gmra.mxu0 %vm126_vm0, %v1214_v2 }
 0xdf2   :  { %2694 = vmatprep.mubr.msk.bf16.mxu0 %vm3004_vm1, %v3003_v12 }
 0xeb1   :  { %v1314_v4 = vpop.f32.mrf.mxu0 }
 0xeb2   :  { %v1315_v11 = vadd.f32 %v1314_v4, %v1230_v5 }
 0xeb3   :  { %v1316_v6 = vpop.f32.mrf.mxu0 }
 0xeb4   :  { %v1317_v18 = vadd.f32 %v1316_v6, %v1234_v10 }
 0xeb5   :  { %v1318_v8 = vpop.f32.mrf.mxu0 }
 0xeb6   :  { %v1319_v13 = vadd.f32 %v1318_v8, %v1230_v5 }
 0xeb7   :  { %v1320_v16 = vpop.f32.mrf.mxu0 }
 0xeb8   :  { %v3432_v19 = vpack.c.bf16 %v1319_v13, %v1315_v11  ;;  %v1321_v20 = vadd.f32 %v1320_v16, %v1234_v10 }
 0xeba   :  { %v3434_v21 = vpack.c.bf16 %v1321_v20, %v1317_v18  ;;  %1334 = vrot.lane.b32.xlu1 %v3432_v19, %s3000_s16 }
 0xebc   :  { %v1411_v15 = vsel %vm264_vm2, %v3434_v21, 0 }
 0xebd   :  { %2699 = vmatpush3.bf16.msra.mxu1 %v1411_v15 }
 0xebe   :  { %1457 = vrot.lane.b32.xlu1 %v3432_v19, %s3006_s8  ;;  %2710 = vmatprep.subr.bf16.mxu1 %v3003_v12 }
 0xec2   :  { %1455 = vrot.lane.b32.xlu1 %v3432_v19, %s3005_s25 }
 0xf2c   :  { %v1335_v14 = vpop.permute.xlu1 %1334 }
 0xf2d   :  { %v1340_v17 = vsel %vm187_vm3, %v1335_v14, 0 }
 0xf2e   :  { %2693 = vmatpush3.bf16.xpose.msra.mxu0 %v1340_v17 }
 0xf2f   :  { %2704 = vmatprep.subr.bf16.mxu0 %v3003_v12 }
 0xf30   :  { %v1458_v22 = vpop.permute.xlu1 %1457 }
 0xf31   :  { %v1463_v23 = vsel %vm187_vm3, %v1458_v22, 0  ;;  %v2851_v22 = vld [vmem:[%s3635_s4 + $0x20] sm:$0xff]  }
 0xf34   :  { %v1456_v24 = vpop.permute.xlu1 %1455 }
 0xf35   :  { %2695 = vmatmul.mubr.msk.bf16.vlgmr.msra.gmra.mxu0 %vm187_vm3, %v3432_v19 }
 0xf36   :  { %2705 = vmatpush3.bf16.xpose.msra.mxu0 %v1463_v23  ;;  %2706 = vmatprep.mubr.msk.bf16.mxu0 %vm3004_vm1, %v3003_v12  ;;  %v2852_v23 = vld [vmem:[%s3635_s4 + $0x28] sm:$0xff]  }
 0xf37   :  { %2716 = vmatprep.subr.bf16.mxu0 %v3003_v12 }
 0xf3d   :  { %2707 = vmatmul.mubr.msk.bf16.vlgmr.msra.gmra.mxu0 %vm187_vm3, %v1456_v24 }
 0xf3e   :  { %2718 = vmatprep.mubr.msk.bf16.mxu0 %vm3004_vm1, %v3003_v12  ;;  %2717 = vmatpush3.bf16.msra.mxu0 %v2852_v23 }
 0xf3f   :  { %2728 = vmatprep.subr.bf16.mxu0 %v3003_v12 }
 0xff5   :  { %v1376_v25 = vpop.f32.mrf.mxu0 }
 0xff6   :  { %v1377_v26 = vadd.f32 %v1376_v25, %v3176_v36 }
 0xff7   :  { %v2696_v28 = vpop.f32.mrf.mxu0 }
 0xff8   :  { %v1383_v30 = vsel %vm235_vm4, %v1377_v26, -inf }
 0xff9   :  { %1384 = vmax.xlane.f32.xlu0 %v1383_v30  ;;  %v1379_v31 = vpop.f32.mrf.mxu0 }
 0xffa   :  { %v1380_v33 = vadd.f32 %v1379_v31, %v3182_v40 }
 0xffb   :  { %v2697_v61 = vpop.f32.mrf.mxu0 }
 0xffc   :  { %v1386_v1 = vsel %vm239_vm5, %v1380_v33, -inf }
 0xffd   :  { %1387 = vmax.xlane.f32.xlu1 %v1386_v1  ;;  %v1499_v29 = vpop.f32.mrf.mxu0 }
 0xffe   :  { %v1500_v34 = vadd.f32 %v3189_v45, %v1499_v29 }
 0xfff   :  { %v2708_v0 = vpop.f32.mrf.mxu0 }
0x1000   :  { %v1506_v32 = vsel %vm235_vm4, %v1500_v34, -inf }
0x1001   :  { %1507 = vmax.xlane.f32.xlu0 %v1506_v32  ;;  %v1502_v35 = vpop.f32.mrf.mxu0 }
0x1002   :  { %v1503_v36 = vadd.f32 %v3196_v50, %v1502_v35 }
0x1003   :  { %v2709_v37 = vpop.f32.mrf.mxu0 }
0x1004   :  { %v1509_v38 = vsel %vm239_vm5, %v1503_v36, -inf }
0x1005   :  { %1510 = vmax.xlane.f32.xlu0 %v1509_v38 }
0x100e   :  { %1682 = vrot.lane.b32.xlu1 %v3432_v19, %s3007_s19 }
0x1082   :  { %v1385_v40 = vpop.xlane.xlu0 %1384 }
0x1083   :  { %v1389_v39 = vsub.f32 %v1377_v26, %v1385_v40 }
0x1085   :  { %v1391_v41 = vmul.f32 1.442695, %v1389_v39 }
0x1086   :  { %v1388_v42 = vpop.xlane.xlu1 %1387 }
0x1087   :  { %2911 = vpow2.f32 %v1391_v41  ;;  %v1390_v45 = vsub.f32 %v1380_v33, %v1388_v42 }
0x1089   :  { %v1393_v43 = vmul.f32 1.442695, %v1390_v45 }
0x108a   :  { %v1508_v27 = vpop.xlane.xlu0 %1507  ;;  %v1683_v61 = vpop.permute.xlu1 %1682 }
0x108b   :  { %2913 = vpow2.f32 %v1393_v43  ;;  %v1512_v44 = vsub.f32 %v1500_v34, %v1508_v27  ;;  %v1688_v0 = vsel %vm187_vm3, %v1683_v61, 0 }
0x108d   :  { %v1514_v46 = vmul.f32 1.442695, %v1512_v44 }
0x108e   :  { %v1511_v47 = vpop.xlane.xlu0 %1510 }
0x108f   :  { %2915 = vpow2.f32 %v1514_v46  ;;  %v1513_v50 = vsub.f32 %v1503_v36, %v1511_v47 }
0x1091   :  { %v1516_v48 = vmul.f32 1.442695, %v1513_v50 }
0x1093   :  { %2917 = vpow2.f32 %v1516_v48 }
0x1094   :  { %v2912_v49 = vpop.eup %2911 }
0x1095   :  { %v1395_v51 = vsel %vm235_vm4, %v2912_v49, 0.0 }
0x1096   :  { %1396 = vadd.xlane.f32.xlu0 %v1395_v51 }
0x1098   :  { %v2914_v53 = vpop.eup %2913 }
0x1099   :  { %v1398_v54 = vsel %vm239_vm5, %v2914_v53, 0.0 }
0x109a   :  { %1399 = vadd.xlane.f32.xlu0 %v1398_v54 }
0x109c   :  { %v2916_v55 = vpop.eup %2915 }
0x109d   :  { %v1518_v57 = vsel %vm235_vm4, %v2916_v55, 0.0 }
0x109e   :  { %1519 = vadd.xlane.f32.xlu0 %v1518_v57 }
0x10a0   :  { %v2918_v58 = vpop.eup %2917 }
0x10a1   :  { %v1521_v59 = vsel %vm239_vm5, %v2918_v58, 0.0 }
0x10a2   :  { %1522 = vadd.xlane.f32.xlu0 %v1521_v59 }
0x10b8   :  { %1530 = vrot.lane.b32.xlu0 %v3434_v21, %s3005_s25 }
0x10bc   :  { %1680 = vrot.lane.b32.xlu0 %v3432_v19, %s3008_s20 }
0x111f   :  { %v1397_v60 = vpop.xlane.xlu0 %1396 }
0x1120   :  { %2919 = vrcp.f32 %v1397_v60 }
0x1123   :  { %v1400_v2 = vpop.xlane.xlu0 %1399 }
0x1124   :  { %2921 = vrcp.f32 %v1400_v2 }
0x1127   :  { %v1520_v9 = vpop.xlane.xlu0 %1519 }
0x1128   :  { %2923 = vrcp.f32 %v1520_v9 }
0x112b   :  { %v1523_v4 = vpop.xlane.xlu0 %1522 }
0x112c   :  { %2925 = vrcp.f32 %v1523_v4 }
0x112d   :  { %v2920_v5 = vpop.eup %2919 }
0x112e   :  { %v1403_v10 = vmul.f32 %v2920_v5, %v2912_v49 }
0x112f   :  { %v1531_v11 = vpop.permute.xlu0 %1530 }
0x1130   :  { %v1536_v16 = vsel %vm264_vm2, %v1531_v11, 0 }
0x1131   :  { %v2922_v6 = vpop.eup %2921 }
0x1132   :  { %v1404_v8 = vmul.f32 %v2922_v6, %v2914_v53 }
0x1133   :  { %v1681_v32 = vpop.permute.xlu0 %1680 }
0x1134   :  { %v1405_v13 = vpack.c.bf16 %v1404_v8, %v1403_v10 }
0x1135   :  { %v2924_v18 = vpop.eup %2923 }
0x1136   :  { %2701 = vmatmul.mubr.msk.bf16.vlgmr.msra.gmra.mxu1 %vm235_vm4, %v1405_v13  ;;  %v1526_v15 = vmul.f32 %v2924_v18, %v2916_v55 }
0x1137   :  { %2711 = vmatpush3.bf16.msra.mxu1 %v1536_v16  ;;  %2712 = vmatprep.mubr.msk.bf16.mxu1 %vm3004_vm1, %v3003_v12 }
0x1138   :  { %2722 = vmatprep.subr.bf16.mxu1 %v3003_v12 }
0x1139   :  { %v2926_v20 = vpop.eup %2925 }
0x113a   :  { %v1527_v14 = vmul.f32 %v2926_v20, %v2918_v58 }
0x113c   :  { %v1528_v17 = vpack.c.bf16 %v1527_v14, %v1526_v15  ;;  %v2853_v15 = vld [vmem:[%s3635_s4 + $0x30] sm:$0xff]  }
0x113e   :  { %2713 = vmatmul.mubr.msk.bf16.vlgmr.msra.gmra.mxu1 %vm235_vm4, %v1528_v17 }
0x113f   :  { %2724 = vmatprep.mubr.msk.bf16.mxu1 %vm3004_vm1, %v3003_v12  ;;  %2723 = vmatpush3.bf16.msra.mxu1 %v2851_v22 }
0x1140   :  { %2734 = vmatprep.subr.bf16.mxu1 %v3003_v12 }
0x11f6   :  { %v1447_v24 = vpop.f32.mrf.mxu1 }
0x11f8   :  { %v2702_v25 = vpop.f32.mrf.mxu1 }
0x11fa   :  { %v1450_v26 = vpop.f32.mrf.mxu1 }
0x11fb   :  { %v1454_v28 = vpack.c.bf16 %v1450_v26, %v1447_v24 }
0x11fc   :  { %v2703_v30 = vpop.f32.mrf.mxu1 }
0x11fd   :  { %2725 = vmatmul.mubr.msk.bf16.vlgmr.msra.gmra.mxu1 %vm187_vm3, %v1454_v28 }
0x11fe   :  { %v1572_v31 = vpop.f32.mrf.mxu1  ;;  %2736 = vmatprep.mubr.msk.bf16.mxu1 %vm3004_vm1, %v3003_v12 }
0x1200   :  { %v2714_v33 = vpop.f32.mrf.mxu1 }
0x1202   :  { %v1575_v1 = vpop.f32.mrf.mxu1 }
0x1203   :  { %v1579_v29 = vpack.c.bf16 %v1575_v1, %v1572_v31 }
0x1204   :  { %v2715_v34 = vpop.f32.mrf.mxu1 }
0x1205   :  { %2719 = vmatmul.mubr.msk.bf16.vlgmr.msra.gmra.mxu0 %vm187_vm3, %v1579_v29 }
0x1206   :  { %2729 = vmatpush3.bf16.xpose.msra.mxu0 %v1688_v0  ;;  %2730 = vmatprep.mubr.msk.bf16.mxu0 %vm3004_vm1, %v3003_v12 }
0x1207   :  { %2740 = vmatprep.subr.bf16.mxu0 %v3003_v12 }
0x120d   :  { %2731 = vmatmul.mubr.msk.bf16.vlgmr.msra.gmra.mxu0 %vm187_vm3, %v1681_v32 }
0x120e   :  { %2742 = vmatprep.mubr.msk.bf16.mxu0 %vm3004_vm1, %v3003_v12  ;;  %2741 = vmatpush3.bf16.msra.mxu0 %v2853_v15 }
0x120f   :  { %2752 = vmatprep.subr.bf16.mxu0 %v3003_v12 }
0x12bd   :  { %v1673_v35 = vpop.f32.mrf.mxu1 }
0x12bf   :  { %v2726_v36 = vpop.f32.mrf.mxu1 }
0x12c1   :  { %v1676_v37 = vpop.f32.mrf.mxu1 }
0x12c3   :  { %v2727_v38 = vpop.f32.mrf.mxu1 }
0x12c5   :  { %v1623_v40 = vpop.f32.mrf.mxu0 }
0x12c6   :  { %v3501_v39 = vadd.f32 %v1673_v35, %v1623_v40 }
0x12c7   :  { %v2720_v41 = vpop.f32.mrf.mxu0 }
0x12c9   :  { %v1626_v42 = vpop.f32.mrf.mxu0 }
0x12ca   :  { %v3503_v45 = vadd.f32 %v1676_v37, %v1626_v42 }
0x12cb   :  { %v2721_v43 = vpop.f32.mrf.mxu0 }
0x12cd   :  { %v1724_v27 = vpop.f32.mrf.mxu0 }
0x12ce   :  { %v1725_v44 = vadd.f32 %v3245_v3, %v1724_v27 }
0x12cf   :  { %v2732_v46 = vpop.f32.mrf.mxu0 }
0x12d0   :  { %v1731_v47 = vsel %vm235_vm4, %v1725_v44, -inf }
0x12d1   :  { %1732 = vmax.xlane.f32.xlu0 %v1731_v47  ;;  %v1727_v50 = vpop.f32.mrf.mxu0 }
0x12d2   :  { %v1728_v48 = vadd.f32 %v3251_v7, %v1727_v50 }
0x12d3   :  { %v2733_v49 = vpop.f32.mrf.mxu0 }
0x12d4   :  { %v1734_v51 = vsel %vm239_vm5, %v1728_v48, -inf }
0x12d5   :  { %1735 = vmax.xlane.f32.xlu1 %v1734_v51 }
0x12e6   :  { %1754 = vrot.lane.b32.xlu1 %v3434_v21, %s3008_s20 }
0x12ea   :  { %1856 = vrot.lane.b32.xlu1 %v3432_v19, %s3009_s29 }
0x135a   :  { %v1733_v53 = vpop.xlane.xlu0 %1732 }
0x135b   :  { %v1737_v54 = vsub.f32 %v1725_v44, %v1733_v53 }
0x135d   :  { %v1739_v3 = vmul.f32 1.442695, %v1737_v54 }
0x135e   :  { %v1736_v55 = vpop.xlane.xlu1 %1735 }
0x135f   :  { %2927 = vpow2.f32 %v1739_v3  ;;  %v1738_v57 = vsub.f32 %v1728_v48, %v1736_v55 }
0x1361   :  { %v1741_v58 = vmul.f32 1.442695, %v1738_v57 }
0x1362   :  { %v1755_v59 = vpop.permute.xlu1 %1754 }
0x1363   :  { %2929 = vpow2.f32 %v1741_v58  ;;  %v1760_v7 = vsel %vm264_vm2, %v1755_v59, 0 }
0x1364   :  { %2735 = vmatpush3.bf16.msra.mxu1 %v1760_v7  ;;  %v2470_v7 = vld [vmem:[%s3636_s5 + $0x1] ss:$0 sm:$0xff] }
0x1365   :  { %2746 = vmatprep.subr.bf16.mxu1 %v3003_v12 }
0x136c   :  { %v2928_v60 = vpop.eup %2927 }
0x136d   :  { %v1743_v2 = vsel %vm235_vm4, %v2928_v60, 0.0 }
0x136e   :  { %1744 = vadd.xlane.f32.xlu0 %v1743_v2 }
0x1370   :  { %v2930_v9 = vpop.eup %2929 }
0x1371   :  { %v1746_v4 = vsel %vm239_vm5, %v2930_v9, 0.0 }
0x1372   :  { %1747 = vadd.xlane.f32.xlu0 %v1746_v4 }
0x1388   :  { %1858 = vrot.lane.b32.xlu0 %v3432_v19, %s3010_s30  ;;  %v1857_v19 = vpop.permute.xlu1 %1856 }
0x13f7   :  { %v1745_v5 = vpop.xlane.xlu0 %1744 }
0x13f8   :  { %2931 = vrcp.f32 %v1745_v5 }
0x13fb   :  { %v1748_v6 = vpop.xlane.xlu0 %1747 }
0x13fc   :  { %2933 = vrcp.f32 %v1748_v6 }
0x13ff   :  { %v1859_v16 = vpop.permute.xlu0 %1858 }
0x1400   :  { %v1864_v20 = vsel %vm187_vm3, %v1859_v16, 0 }
0x1405   :  { %v2932_v10 = vpop.eup %2931 }
0x1406   :  { %v1751_v11 = vmul.f32 %v2932_v10, %v2928_v60 }
0x1409   :  { %v2934_v8 = vpop.eup %2933 }
0x140a   :  { %v1752_v13 = vmul.f32 %v2934_v8, %v2930_v9 }
0x140c   :  { %v1753_v18 = vpack.c.bf16 %v1752_v13, %v1751_v11 }
0x140e   :  { %2737 = vmatmul.mubr.msk.bf16.vlgmr.msra.gmra.mxu1 %vm235_vm4, %v1753_v18 }
0x140f   :  { %2747 = vmatpush3.bf16.xpose.msra.mxu1 %v1864_v20  ;;  %2748 = vmatprep.mubr.msk.bf16.mxu1 %vm3004_vm1, %v3003_v12 }
0x1410   :  { %2758 = vmatprep.subr.bf16.mxu1 %v3003_v12 }
0x1416   :  { %2749 = vmatmul.mubr.msk.bf16.vlgmr.msra.gmra.mxu1 %vm187_vm3, %v1857_v19 }
0x1417   :  { %2760 = vmatprep.mubr.msk.bf16.mxu1 %vm3004_vm1, %v3003_v12 }
0x14ce   :  { %v1796_v14 = vpop.f32.mrf.mxu1 }
0x14d0   :  { %v2738_v17 = vpop.f32.mrf.mxu1 }
0x14d2   :  { %v1799_v22 = vpop.f32.mrf.mxu1 }
0x14d3   :  { %v1803_v23 = vpack.c.bf16 %v1799_v22, %v1796_v14 }
0x14d4   :  { %v2739_v24 = vpop.f32.mrf.mxu1 }
0x14d5   :  { %2743 = vmatmul.mubr.msk.bf16.vlgmr.msra.gmra.mxu0 %vm187_vm3, %v1803_v23 }
0x14d6   :  { %v1900_v25 = vpop.f32.mrf.mxu1  ;;  %2754 = vmatprep.mubr.msk.bf16.mxu0 %vm3004_vm1, %v3003_v12 }
0x14d7   :  { %v1901_v26 = vadd.f32 %v3281_v52, %v1900_v25  ;;  %v2855_v25 = vld [vmem:[#allocation2 + $0x38] sm:$0xff]  }
0x14d8   :  { %v2750_v28 = vpop.f32.mrf.mxu1 }
0x14d9   :  { %v1907_v30 = vsel %vm235_vm4, %v1901_v26, -inf  ;;  %v2858_v28 = vld [vmem:[#allocation2 + $0x20] sm:$0xff]  }
0x14da   :  { %1908 = vmax.xlane.f32.xlu1 %v1907_v30  ;;  %v1903_v31 = vpop.f32.mrf.mxu1 }
0x14db   :  { %v1904_v33 = vadd.f32 %v3290_v56, %v1903_v31 }
0x14dc   :  { %v2751_v61 = vpop.f32.mrf.mxu1 }
0x14dd   :  { %v1910_v1 = vsel %vm239_vm5, %v1904_v33, -inf }
0x14de   :  { %1911 = vmax.xlane.f32.xlu0 %v1910_v1 }
0x1563   :  { %v1909_v29 = vpop.xlane.xlu1 %1908 }
0x1564   :  { %v1913_v34 = vsub.f32 %v1901_v26, %v1909_v29  ;;  %v2857_v26 = vld [vmem:[#allocation2 + $0x28] sm:$0xff]  }
0x1566   :  { %v1915_v0 = vmul.f32 1.442695, %v1913_v34 }
0x1567   :  { %v1912_v32 = vpop.xlane.xlu0 %1911 }
0x1568   :  { %2935 = vpow2.f32 %v1915_v0  ;;  %v1914_v35 = vsub.f32 %v1904_v33, %v1912_v32  ;;  %v2473_v32 = vld [vmem:[%s3637_s6 + $0x1] ss:$0 sm:$0xff] }
0x156a   :  { %v1917_v36 = vmul.f32 1.442695, %v1914_v35 }
0x156c   :  { %2937 = vpow2.f32 %v1917_v36 }
0x1575   :  { %v2936_v52 = vpop.eup %2935 }
0x1576   :  { %v1919_v37 = vsel %vm235_vm4, %v2936_v52, 0.0 }
0x1577   :  { %1920 = vadd.xlane.f32.xlu0 %v1919_v37  ;;  %v2474_v37 = vld [vmem:[%s3638_s7 + $0x1] ss:$0 sm:$0xff] }
0x1579   :  { %v2938_v38 = vpop.eup %2937 }
0x157a   :  { %v1922_v40 = vsel %vm239_vm5, %v2938_v38, 0.0 }
0x157b   :  { %1923 = vadd.xlane.f32.xlu1 %v1922_v40 }
0x158d   :  { %1930 = vrot.lane.b32.xlu0 %v3434_v21, %s3009_s29 }
0x1595   :  { %v1847_v56 = vpop.f32.mrf.mxu0 }
0x1596   :  { %v1854_v41 = vadd.f32 %v1847_v56, %v3501_v39 }
0x1597   :  { %v2744_v42 = vpop.f32.mrf.mxu0 }
0x1598   :  { %v2859_v42 = vld [vmem:[%s3641_s10 + $0x78] sm:$0xff]  }
0x1599   :  { %v1850_v43 = vpop.f32.mrf.mxu0 }
0x159a   :  { %v1855_v27 = vadd.f32 %v1850_v43, %v3503_v45  ;;  %v2854_v45 = vld [vmem:[%s3635_s4 + $0x38] sm:$0xff]   ;;  %v2860_v43 = vld [vmem:[%s3641_s10 + $0x70] sm:$0xff]   ;;  %s3011_s4 = smov [#allocation5]  }
0x159b   :  { %v2745_v44 = vpop.f32.mrf.mxu0  ;;  %2759 = vmatpush3.bf16.msra.mxu1 %v2854_v45  ;;  %s2364_s5 = sshll.u32 %s3011_s4, 4  ;;  %s2365_s5 = int_to_ptr.vmem [resolvable:$true] %s2364_s5 }
0x159c   :  { %2776 = vmatprep.subr.bf16.mxu1 %v3003_v12  ;;  %v2862_v44 = vld [vmem:[%s3641_s10 + $0x60] sm:$0xff]   ;;  %s2975_s26 = scalar_lea.vmem %s2365_s5, 256  ;;  %p2980_p6 = scmp.lt.s32.totalorder %s2365_s5, %s2365_s5 }
0x159d   :  { %p2976_p5 = scmp.ne.s32.totalorder %s2365_s5, %s2975_s26  ;;  %p2981_p7 = scmp.lt.s32.totalorder %s2975_s26, %s2975_s26 }
0x159f   :  { %p2982_p8 = por %p2981_p7, %p2980_p6 }
0x15a1   :  { %p2983_p9 = pnand %p2982_p8, %p2976_p5 }
0x1600   :  { %v1921_v46 = vpop.xlane.xlu0 %1920 }
0x1601   :  { %2939 = vrcp.f32 %v1921_v46  ;;  %v2863_v46 = vld [vmem:[%s3641_s10 + $0x58] sm:$0xff]  }
0x1604   :  { %v1924_v47 = vpop.xlane.xlu1 %1923  ;;  %v1931_v50 = vpop.permute.xlu0 %1930 }
0x1605   :  { %2941 = vrcp.f32 %v1924_v47  ;;  %v1936_v48 = vsel %vm264_vm2, %v1931_v50, 0  ;;  %v2864_v47 = vld [vmem:[%s3641_s10 + $0x50] sm:$0xff]   ;;  %v2865_v50 = vld [vmem:[%s3641_s10 + $0x48] sm:$0xff]  }
0x1606   :  { %2753 = vmatpush3.bf16.msra.mxu0 %v1936_v48  ;;  %v2866_v48 = vld [vmem:[%s3641_s10 + $0x40] sm:$0xff]  }
0x1607   :  { %2764 = vmatprep.subr.bf16.mxu0 %v3003_v12 }
0x160e   :  { %v2940_v49 = vpop.eup %2939 }
0x160f   :  { %v1927_v51 = vmul.f32 %v2940_v49, %v2936_v52  ;;  %v2476_v49 = vld [vmem:[%s3640_s9 + $0x1] ss:$0 sm:$0xff] }
0x1612   :  { %v2942_v21 = vpop.eup %2941 }
0x1613   :  { %v1928_v53 = vmul.f32 %v2942_v21, %v2938_v38 }
0x1615   :  { %v1929_v39 = vpack.c.bf16 %v1928_v53, %v1927_v51 }
0x1617   :  { %2755 = vmatmul.mubr.msk.bf16.vlgmr.msra.gmra.mxu0 %vm235_vm4, %v1929_v39 }
0x1618   :  { %2772 = vmatprep.mubr.msk.bf16.mxu0 %vm3004_vm1, %v3003_v12  ;;  %2765 = vmatpush3.bf16.msra.mxu0 %v2855_v25 }
0x1619   :  { %2766 = vmatprep.subr.bf16.mxu0 %v3003_v12 }
0x16d7   :  { %v1972_v54 = vpop.f32.mrf.mxu0 }
0x16d9   :  { %v2756_v3 = vpop.f32.mrf.mxu0 }
0x16db   :  { %v1975_v55 = vpop.f32.mrf.mxu0 }
0x16dc   :  { %v1979_v57 = vpack.c.bf16 %v1975_v55, %v1972_v54 }
0x16dd   :  { %v2757_v58 = vpop.f32.mrf.mxu0 }
0x16de   :  { %2761 = vmatmul.mubr.msk.bf16.vlgmr.msra.gmra.mxu1 %vm187_vm3, %v1979_v57 }
0x16df   :  { %2792 = vmatprep.mubr.msk.bf16.mxu1 %vm3004_vm1, %v3003_v12  ;;  %2777 = vmatpush3.bf16.msra.mxu1 %v2859_v42  ;;  %v2511_v42 = vld [vmem:[%s3644_s13 + $0x1] ss:$0 sm:$0xff] }
0x16e0   :  { %2778 = vmatprep.subr.bf16.mxu1 %v3003_v12 }
0x16e3   :  { %2779 = vmatpush3.bf16.msra.mxu1 %v2860_v43 }
0x16e4   :  { %2780 = vmatprep.subr.bf16.mxu1 %v3003_v12 }
0x179e   :  { %v2023_v59 = vpop.f32.mrf.mxu1 }
0x179f   :  { %v2030_v60 = vadd.f32 %v2023_v59, %v1854_v41 }
0x17a0   :  { %v2762_v2 = vpop.f32.mrf.mxu1 }
0x17a1   :  { %v2040_v9 = vadd.f32 %v2470_v7, %v2030_v60 }
0x17a2   :  { %v2026_v4 = vpop.f32.mrf.mxu1 }
0x17a3   :  { %v2031_v5 = vadd.f32 %v2026_v4, %v1855_v27  ;;  %v2042_v6 = vadd.f32 %v2040_v9, %v3416_v62  ;;  %v2861_v27 = vld [vmem:[%s3641_s10 + $0x68] sm:$0xff]  }
0x17a4   :  { %v2763_v10 = vpop.f32.mrf.mxu1  ;;  %2781 = vmatpush3.bf16.msra.mxu1 %v2861_v27 }
0x17a5   :  { %v2041_v8 = vadd.f32 %v2470_v7, %v2031_v5  ;;  %v2048_v11 = vsel %vm126_vm0, %v2042_v6, 0.0  ;;  %2782 = vmatprep.subr.bf16.mxu1 %v3003_v12 }
0x17a6   :  { %2049 = vadd.xlane.f32.xlu1 %v2048_v11 }
0x17a7   :  { %v2043_v13 = vadd.f32 %v2041_v8, %v3418_v63  ;;  %v2856_v63 = vld [vmem:[#allocation2 + $0x30] sm:$0xff]  }
0x17a8   :  { %2767 = vmatpush3.bf16.msra.mxu0 %v2856_v63  ;;  %2783 = vmatpush3.bf16.msra.mxu1 %v2862_v44 }
0x17a9   :  { %v2051_v16 = vsel %vm912_vm6, %v2043_v13, 0.0  ;;  %2768 = vmatprep.subr.bf16.mxu0 %v3003_v12  ;;  %2784 = vmatprep.subr.bf16.mxu1 %v3003_v12 }
0x17aa   :  { %2052 = vadd.xlane.f32.xlu1 %v2051_v16 }
0x17ac   :  { %2769 = vmatpush3.bf16.msra.mxu0 %v2857_v26  ;;  %2785 = vmatpush3.bf16.msra.mxu1 %v2863_v46 }
0x17ad   :  { %2770 = vmatprep.subr.bf16.mxu0 %v3003_v12  ;;  %2786 = vmatprep.subr.bf16.mxu1 %v3003_v12 }
0x17b0   :  { %2771 = vmatpush3.bf16.msra.mxu0 %v2858_v28  ;;  %2787 = vmatpush3.bf16.msra.mxu1 %v2864_v47 }
0x17b1   :  { %2788 = vmatprep.subr.bf16.mxu1 %v3003_v12 }
0x17b4   :  { %2789 = vmatpush3.bf16.msra.mxu1 %v2865_v50 }
0x17b5   :  { %2790 = vmatprep.subr.bf16.mxu1 %v3003_v12 }
0x17b8   :  { %2791 = vmatpush3.bf16.msra.mxu1 %v2866_v48 }
0x182f   :  { %v2050_v18 = vpop.xlane.xlu1 %2049 }
0x1830   :  { %v2054_v20 = vmul.f32 0.015625, %v2050_v18 }
0x1832   :  { %v2056_v19 = vsub.f32 %v2042_v6, %v2054_v20  ;;  %v2499_v20 = vld [vmem:[%s3642_s11 + $0x1] ss:$0 sm:$0xff] }
0x1833   :  { %v2053_v15 = vpop.xlane.xlu1 %2052 }
0x1834   :  { %v2055_v14 = vmul.f32 0.015625, %v2053_v15  ;;  %v2058_v17 = vmul.f32 %v2056_v19, %v2056_v19 }
0x1836   :  { %v2057_v22 = vsub.f32 %v2043_v13, %v2055_v14  ;;  %v2060_v23 = vsel %vm126_vm0, %v2058_v17, 0.0 }
0x1837   :  { %2061 = vadd.xlane.f32.xlu1 %v2060_v23 }
0x1838   :  { %v2059_v62 = vmul.f32 %v2057_v22, %v2057_v22 }
0x183a   :  { %v2063_v24 = vsel %vm912_vm6, %v2059_v62, 0.0 }
0x183b   :  { %2064 = vadd.xlane.f32.xlu1 %v2063_v24 }
0x18c0   :  { %v2062_v30 = vpop.xlane.xlu1 %2061 }
0x18c1   :  { %v2066_v31 = vmul.f32 0.015625, %v2062_v30 }
0x18c3   :  { %v2068_v33 = vadd.f32 1e-05, %v2066_v31 }
0x18c4   :  { %v2065_v61 = vpop.xlane.xlu1 %2064 }
0x18c5   :  { %2943 = vrsqrt.f32 %v2068_v33  ;;  %v2067_v1 = vmul.f32 0.015625, %v2065_v61 }
0x18c7   :  { %v2069_v29 = vadd.f32 1e-05, %v2067_v1 }
0x18c9   :  { %2945 = vrsqrt.f32 %v2069_v29 }
0x18d2   :  { %v2944_v34 = vpop.eup %2943 }
0x18d3   :  { %v2072_v0 = vmul.f32 %v2944_v34, %v2056_v19 }
0x18d5   :  { %v2080_v52 = vmul.f32 %v2473_v32, %v2072_v0 }
0x18d6   :  { %v2946_v35 = vpop.eup %2945 }
0x18d7   :  { %v2073_v36 = vmul.f32 %v2946_v35, %v2057_v22  ;;  %v2088_v40 = vadd.f32 %v2474_v37, %v2080_v52 }
0x18d9   :  { %v2081_v38 = vmul.f32 %v2473_v32, %v2073_v36 }
0x18db   :  { %v3574_v56 = vadd.f32 %v2474_v37, %v2081_v38 }
0x18dd   :  { %v2090_v41 = vpack.c.bf16 %v3574_v56, %v2088_v40 }
0x18df   :  { %2773 = vmatmul.mubr.msk.bf16.vlgmr.msra.gmra.mxu0 %vm126_vm0, %v2090_v41 }
0x199f   :  { %v2169_v21 = vpop.f32.mrf.mxu0 }
0x19a0   :  { %v2170_v51 = vadd.f32 %v2476_v49, %v2169_v21 }
0x19a1   :  { %v2774_v53 = vpop.f32.mrf.mxu0 }
0x19a2   :  { %v2178_v39 = vmul.f32 0.044715, %v2170_v51  ;;  %v2176_v10 = vmul.f32 0.5, %v2170_v51 }
0x19a3   :  { %v2172_v45 = vpop.f32.mrf.mxu0 }
0x19a4   :  { %v2180_v54 = vmul.f32 %v2178_v39, %v2170_v51  ;;  %v2173_v3 = vadd.f32 %v2476_v49, %v2172_v45 }
0x19a5   :  { %v2775_v55 = vpop.f32.mrf.mxu0 }
0x19a6   :  { %v2182_v57 = vmul.f32 %v2180_v54, %v2170_v51  ;;  %v2179_v58 = vmul.f32 0.044715, %v2173_v3  ;;  %v2177_v8 = vmul.f32 0.5, %v2173_v3 }
0x19a8   :  { %v2184_v59 = vadd.f32 %v2182_v57, %v2170_v51  ;;  %v2181_v7 = vmul.f32 %v2179_v58, %v2173_v3 }
0x19aa   :  { %v2186_v60 = vmul.f32 0.7978846, %v2184_v59  ;;  %v2183_v2 = vmul.f32 %v2181_v7, %v2173_v3 }
0x19ac   :  { %2947 = vtanh.f32 %v2186_v60  ;;  %v2185_v12 = vadd.f32 %v2183_v2, %v2173_v3 }
0x19ae   :  { %v2187_v9 = vmul.f32 0.7978846, %v2185_v12 }
0x19b0   :  { %2949 = vtanh.f32 %v2187_v9 }
0x19b9   :  { %v2948_v4 = vpop.eup %2947 }
0x19ba   :  { %v2190_v5 = vadd.f32 1.0, %v2948_v4 }
0x19bc   :  { %v2192_v13 = vmul.f32 %v2190_v5, %v2176_v10 }
0x19bd   :  { %v2950_v6 = vpop.eup %2949 }
0x19be   :  { %v2191_v11 = vadd.f32 1.0, %v2950_v6 }
0x19c0   :  { %v2193_v16 = vmul.f32 %v2191_v11, %v2177_v8 }
0x19c2   :  { %v2194_v18 = vpack.c.bf16 %v2193_v16, %v2192_v13 }
0x19c4   :  { %2793 = vmatmul.mubr.bf16.vlgmr.msra.gmra.mxu1 %v2194_v18 }
0x1a84   :  { %v2302_v19 = vpop.f32.mrf.mxu1 }
0x1a85   :  { %v2303_v15 = vadd.f32 %v2499_v20, %v2302_v19 }
0x1a86   :  { %v2794_v14 = vpop.f32.mrf.mxu1 }
0x1a87   :  { %v2309_v17 = vadd.f32 %v2303_v15, %v2088_v40 }
0x1a88   :  { %v2305_v22 = vpop.f32.mrf.mxu1 }
0x1a89   :  { %v2306_v23 = vadd.f32 %v2499_v20, %v2305_v22  ;;  %v2315_v62 = vsel %vm126_vm0, %v2309_v17, 0.0 }
0x1a8a   :  { %2316 = vadd.xlane.f32.xlu1 %v2315_v62  ;;  %v2795_v24 = vpop.f32.mrf.mxu1 }
0x1a8b   :  { %v2310_v25 = vadd.f32 %v2306_v23, %v3574_v56  ;;  %v2510_v56 = vld [vmem:[%s3643_s12 + $0x1] ss:$0 sm:$0xff] }
0x1a8d   :  { %v2318_v63 = vsel %vm912_vm6, %v2310_v25, 0.0 }
0x1a8e   :  { %2319 = vadd.xlane.f32.xlu1 %v2318_v63 }
0x1b13   :  { %v2317_v26 = vpop.xlane.xlu1 %2316 }
0x1b14   :  { %v2321_v28 = vmul.f32 0.015625, %v2317_v26 }
0x1b16   :  { %v2323_v30 = vsub.f32 %v2309_v17, %v2321_v28 }
0x1b17   :  { %v2320_v31 = vpop.xlane.xlu1 %2319 }
0x1b18   :  { %v2322_v33 = vmul.f32 0.015625, %v2320_v31  ;;  %v2325_v61 = vmul.f32 %v2323_v30, %v2323_v30 }
0x1b1a   :  { %v2324_v1 = vsub.f32 %v2310_v25, %v2322_v33  ;;  %v2327_v29 = vsel %vm126_vm0, %v2325_v61, 0.0 }
0x1b1b   :  { %2328 = vadd.xlane.f32.xlu0 %v2327_v29 }
0x1b1c   :  { %v2326_v34 = vmul.f32 %v2324_v1, %v2324_v1 }
0x1b1e   :  { %v2330_v0 = vsel %vm912_vm6, %v2326_v34, 0.0 }
0x1b1f   :  { %2331 = vadd.xlane.f32.xlu1 %v2330_v0 }
0x1ba4   :  { %v2329_v32 = vpop.xlane.xlu0 %2328 }
0x1ba5   :  { %v2333_v35 = vmul.f32 0.015625, %v2329_v32 }
0x1ba7   :  { %v2335_v36 = vadd.f32 1e-05, %v2333_v35 }
0x1ba8   :  { %v2332_v52 = vpop.xlane.xlu1 %2331 }
0x1ba9   :  { %2951 = vrsqrt.f32 %v2335_v36  ;;  %v2334_v37 = vmul.f32 0.015625, %v2332_v52 }
0x1bab   :  { %v2336_v38 = vadd.f32 1e-05, %v2334_v37 }
0x1bad   :  { %2953 = vrsqrt.f32 %v2336_v38 }
0x1bb6   :  { %v2952_v40 = vpop.eup %2951 }
0x1bb7   :  { %v2339_v41 = vmul.f32 %v2952_v40, %v2323_v30 }
0x1bb9   :  { %v2347_v43 = vmul.f32 %v2510_v56, %v2339_v41 }
0x1bba   :  { %v2954_v27 = vpop.eup %2953 }
0x1bbb   :  { %v2340_v44 = vmul.f32 %v2954_v27, %v2324_v1  ;;  %v2355_v46 = vadd.f32 %v2511_v42, %v2347_v43 }
0x1bbd   :  { %v2348_v47 = vmul.f32 %v2510_v56, %v2340_v44  ;;  %2357 = vst.msk [vmem:[#allocation5] sm:$0xff] %vm126_vm0, %v2355_v46 }
0x1bbf   :  { %v2356_v50 = vadd.f32 %v2511_v42, %v2348_v47 }
0x1bc1   :  { %2358 = vst.msk [vmem:[#allocation5 + $0x8] sm:$0x3] %vm912_vm6, %v2356_v50 }
0x1bc2   :  { %2986 = shalt.err (!%p2983_p9)
}
0x1bc3   :  { %s3012_s12 = smov 128   ;;  %s3013_s13 = smov 8  }
0x1bc4   :  { %2370 = dma.vmem_to_hbm [thread:$0]  %s2365_s5, 256, %s3645_s14, [#allocation4], %s3012_s12, %s3012_s12, %s3013_s13  }
0x1bc5   :  { %2997 = dma.done.wait [#allocation4], 256  }
0x1bc6   :  { %2998 = vsyncadd [#allocation4], 4294967040 }
0x1bc7   :  { %2374 = vsyncpa [#allocation3], 1 }
0x1bc8   :  { %2375 = vsyncpa [#allocation4], 1 }

</bundles_post_ra>
